<compile_context>
chip_gen: v5e
topology: v5e:2x2
jax: 0.10.0
libtpu: 0.0.40
codegen_flags: <defaults>
</compile_context>

<pallas_src>
import functools

import jax
import jax.numpy as jnp
import numpy as np
from jax.experimental import pallas as pl
from jax.experimental.pallas import tpu as pltpu


# ----------------------------------------------------------------------------
# Pallas kernel: windowed DFT (fused matrix) -> magnitude -> per-lane partials
# ----------------------------------------------------------------------------
def _stft_loss_kernel(fxy_ref, d_hbm_ref, dd_ref, yy_ref, ld_ref, d_vmem_ref,
                      *, n_fft, n_half, tile):
    i = pl.program_id(1)

    @pl.when(i == 0)
    def _():
        # D has a constant index map -> keep exactly ONE copy in VMEM
        # (no pipeline double-buffering of the dominant VMEM consumer).
        pltpu.sync_copy(d_hbm_ref, d_vmem_ref)
        dd_ref[...] = jnp.zeros_like(dd_ref)
        yy_ref[...] = jnp.zeros_like(yy_ref)
        ld_ref[...] = jnp.zeros_like(ld_ref)

    # (2, tile, n_fft) -> (2*tile, n_fft): leading-dim collapse, free.
    f = fxy_ref[...].reshape(2 * tile, n_fft)

    # One MXU dot per grid step for BOTH signals (RHS pushed once).
    s = jnp.dot(f, d_vmem_ref[...], preferred_element_type=jnp.float32)

    # real | imag halves are lane-aligned (n_half is a multiple of 128).
    re = s[:, :n_half]
    im = s[:, n_half:]
    mag2 = jnp.maximum(re * re + im * im, 1e-7)     # clamp on squared magnitude
    mx2 = mag2[:tile]                               # predicted (x)
    my2 = mag2[tile:]                               # groundtruth (y)

    # (|Y|-|X|)^2 = mx2 + my2 - 2*sqrt(mx2*my2): 1 EUP sqrt instead of 2.
    dd_ref[...] += jnp.sum(mx2 + my2 - 2.0 * jnp.sqrt(mx2 * my2),
                           axis=0, keepdims=True)
    yy_ref[...] += jnp.sum(my2, axis=0, keepdims=True)
    # |log|Y| - log|X|| = 0.5 * |log my2 - log mx2|
    ld_ref[...] += 0.5 * jnp.sum(jnp.abs(jnp.log(my2) - jnp.log(mx2)),
                                 axis=0, keepdims=True)


# ----------------------------------------------------------------------------
# Host-side helpers (framing, window-fused DFT matrix, chip queries)
# ----------------------------------------------------------------------------
def _round_up(v, m):
    return -(-v // m) * m


def _hann_window_padded_np(win_length, n_fft):
    n = np.arange(win_length, dtype=np.float64)
    w = 0.5 - 0.5 * np.cos(2.0 * np.pi * n / win_length)   # torch periodic hann
    lp = (n_fft - win_length) // 2
    out = np.zeros(n_fft, dtype=np.float64)
    out[lp:lp + win_length] = w
    return out


def _dft_matrix(n_fft, win_length):
    """Window-fused one-sided DFT matrix [win*cos | -win*sin], lane-padded."""
    n_freq = n_fft // 2 + 1
    n_half = _round_up(n_freq, 128)
    win = _hann_window_padded_np(win_length, n_fft)
    n = np.arange(n_fft, dtype=np.float64)[:, None]
    k = np.arange(n_freq, dtype=np.float64)[None, :]
    ang = 2.0 * np.pi * n * k / n_fft
    d = np.zeros((n_fft, 2 * n_half), dtype=np.float32)
    d[:, :n_freq] = (np.cos(ang) * win[:, None]).astype(np.float32)
    d[:, n_half:n_half + n_freq] = (-np.sin(ang) * win[:, None]).astype(np.float32)
    return jnp.asarray(d), n_freq, n_half


def _frames(sig, n_fft, hop):
    """torch.stft framing (center=True, reflect pad) with NO XLA gather,
    for any hop size (hop need not divide n_fft)."""
    B = sig.shape[0]
    pad = n_fft // 2
    sp = jnp.pad(sig, ((0, 0), (pad, pad)), mode='reflect')
    L = sp.shape[1]
    n_frames = 1 + (L - n_fft) // hop
    q, r = divmod(n_fft, hop)
    rows_needed = n_frames + q - (1 if r == 0 else 0)
    need = rows_needed * hop
    if need > L:
        # trailing zeros only needed to make the reshape legal; never read by a frame
        sp = jnp.pad(sp, ((0, 0), (0, need - L)))
    s = sp[:, :need].reshape(B, rows_needed, hop)
    parts = [s[:, j:j + n_frames, :] for j in range(q)]
    if r > 0:
        parts.append(s[:, q:q + n_frames, :r])
    fr = jnp.concatenate(parts, axis=-1)            # (B, n_frames, n_fft)
    return fr.reshape(B * n_frames, n_fft), n_frames


def _num_chunks_default():
    """2 only for v7x-class parts (2 TensorCores/chip); 1 for v5e/v6e."""
    try:
        kind = jax.devices()[0].device_kind.lower()
    except Exception:
        return 1
    return 2 if ("v7" in kind or "7x" in kind) else 1


def _vmem_capacity_bytes():
    try:
        return int(pltpu.get_tpu_info().vmem_capacity_bytes)
    except Exception:
        return 64 * 1024 * 1024     # conservative (v7x physical per-TC VMEM)


def _vmem_bytes(tile, n_fft, n_half):
    d_bytes = n_fft * 2 * n_half * 4                 # resident single-buffered D
    in_bytes = 2 * (2 * tile * n_fft) * 4            # stacked frames, double-buffered
    mm_bytes = 2 * (2 * tile) * (2 * n_half) * 4     # matmul result + magnitude temps
    out_bytes = 3 * 2 * n_half * 4                   # tiny resident accumulators
    return d_bytes + in_bytes + mm_bytes + out_bytes


# ----------------------------------------------------------------------------
# Per-resolution STFT loss
# ----------------------------------------------------------------------------
def stft_loss_pallas(x, y, n_fft, hop, win_length, *, tile=None, n_chunks=None):
    B, T = x.shape
    assert T > n_fft // 2, "signal too short for reflect padding"

    if n_chunks is None:
        n_chunks = _num_chunks_default()

    # Stack predicted/groundtruth so the kernel issues ONE MXU dot per step.
    # TODO(synk): stream the reflect-padded signal straight into the kernel
    # (manual DMA framing) to avoid the r x HBM amplification of the frame matrix.
    sig2 = jnp.stack([x.astype(jnp.float32), y.astype(jnp.float32)], axis=0)
    fr, n_frames = _frames(sig2.reshape(2 * B, T), n_fft, hop)
    rows = B * n_frames
    fxy = fr.reshape(2, rows, n_fft)                 # [0] = x frames, [1] = y frames

    d, n_freq, n_half = _dft_matrix(n_fft, win_length)

    # Row tile scales inversely with n_fft (amortize per-step overhead), then
    # clamped to the problem and to a chip-aware VMEM budget.
    if tile is None:
        if n_fft <= 256:
            tile = 1024
        elif n_fft <= 512:
            tile = 512
        elif n_fft <= 1024:
            tile = 256
        else:
            tile = 128
    tile = max(8, min(tile, _round_up(-(-rows // n_chunks), 8)))

    vmem_budget = int(0.72 * _vmem_capacity_bytes())
    while _vmem_bytes(tile, n_fft, n_half) > vmem_budget and tile > 8:
        tile = max(8, _round_up(tile // 2, 8))

    rows_pad = _round_up(rows, n_chunks * tile)
    tiles_per_chunk = rows_pad // (n_chunks * tile)

    # Pad rows with exact zeros -> no in-kernel row mask required.
    fxy = jnp.pad(fxy, ((0, 0), (0, rows_pad - rows), (0, 0)))

    kernel = functools.partial(_stft_loss_kernel,
                               n_fft=n_fft, n_half=n_half, tile=tile)

    part_shape = jax.ShapeDtypeStruct((n_chunks, 1, n_half), jnp.float32)
    part_spec = pl.BlockSpec((None, 1, n_half), lambda c, i: (c, 0, 0))
    frame_spec = pl.BlockSpec((2, tile, n_fft),
                              lambda c, i: (0, c * tiles_per_chunk + i, 0))

    vmem_need = _vmem_bytes(tile, n_fft, n_half)
    cp = dict(dimension_semantics=("parallel", "arbitrary"))
    if vmem_need > 12 * 1024 * 1024:   # only raise the limit when actually needed
        cp["vmem_limit_bytes"] = int(min(vmem_need * 13 // 10 + (1 << 20),
                                         vmem_budget))

    cost = pl.CostEstimate(
        flops=int(2 * (2 * rows_pad) * n_fft * (2 * n_half)),
        transcendentals=int(3 * rows_pad * n_half),
        bytes_accessed=int((2 * rows_pad * n_fft + n_fft * 2 * n_half
                            + 3 * n_chunks * n_half) * 4),
    )

    dd, yy, ld = pl.pallas_call(
        kernel,
        out_shape=(part_shape, part_shape, part_shape),
        grid=(n_chunks, tiles_per_chunk),
        in_specs=[
            frame_spec,
            pl.BlockSpec(memory_space=pl.ANY),   # D stays in HBM; copied once/core
        ],
        out_specs=(part_spec, part_spec, part_spec),
        scratch_shapes=[pltpu.VMEM((n_fft, 2 * n_half), jnp.float32)],
        compiler_params=pltpu.CompilerParams(**cp),
        cost_estimate=cost,
    )(fxy, d)

    # Padded rows / padded freq lanes contribute exactly clamp(0, 1e-7) each to
    # ||Y||_F^2 (and ~0 to the other two sums) -> subtract the known constant
    # instead of masking in the kernel.
    pad_bias = float(np.float32(1e-7)) * (rows_pad * n_half - rows * n_freq)
    sum_dd = jnp.sum(dd)
    sum_yy = jnp.sum(yy) - jnp.float32(pad_bias)
    sum_ld = jnp.sum(ld)

    sc_loss = jnp.sqrt(sum_dd) / jnp.sqrt(sum_yy)
    mag_loss = sum_ld / jnp.float32(rows * n_freq)
    return sc_loss, mag_loss


@functools.partial(jax.jit,
                   static_argnames=("fft_sizes", "hop_sizes", "win_lengths"))
def multi_resolution_stft_loss(x, y,
                               fft_sizes=(1024, 2048, 512),
                               hop_sizes=(120, 240, 50),
                               win_lengths=(600, 1200, 240)):
    assert len(fft_sizes) == len(hop_sizes) == len(win_lengths)
    sc_total = jnp.float32(0.0)
    mag_total = jnp.float32(0.0)
    for fs, hs, wl in zip(fft_sizes, hop_sizes, win_lengths):
        sc, mag = stft_loss_pallas(x, y, fs, hs, wl)
        sc_total = sc_total + sc
        mag_total = mag_total + mag
    n = len(fft_sizes)
    return sc_total / n, mag_total / n


# ----------------------------------------------------------------------------
# Pure-JAX reference (independent gather-based framing + jnp.fft.rfft)
# ----------------------------------------------------------------------------
def _ref_frames(sig, n_fft, hop):
    B = sig.shape[0]
    pad = n_fft // 2
    sp = jnp.pad(sig, ((0, 0), (pad, pad)), mode='reflect')
    n_frames = 1 + (sp.shape[1] - n_fft) // hop
    idx = jnp.arange(n_frames)[:, None] * hop + jnp.arange(n_fft)[None, :]
    return sp[:, idx].reshape(B * n_frames, n_fft)


def _hann_window_padded(win_length, n_fft):
    n = jnp.arange(win_length, dtype=jnp.float32)
    w = 0.5 - 0.5 * jnp.cos(2.0 * jnp.pi * n / win_length)
    lp = (n_fft - win_length) // 2
    return jnp.pad(w, (lp, n_fft - win_length - lp)).astype(jnp.float32)


def _ref_single(x, y, fs, hs, wl):
    def mag(sig):
        fr = _ref_frames(sig.astype(jnp.float32), fs, hs)
        w = _hann_window_padded(wl, fs)
        spec = jnp.fft.rfft(fr * w, axis=-1)
        return jnp.sqrt(jnp.maximum(
            jnp.real(spec) ** 2 + jnp.imag(spec) ** 2, 1e-7))
    mx, my = mag(x), mag(y)
    sc = jnp.sqrt(jnp.sum((my - mx) ** 2)) / jnp.sqrt(jnp.sum(my ** 2))
    ml = jnp.mean(jnp.abs(jnp.log(my) - jnp.log(mx)))
    return sc, ml


def _ref_multi(x, y, fft_sizes, hop_sizes, win_lengths):
    scs, mls = [], []
    for fs, hs, wl in zip(fft_sizes, hop_sizes, win_lengths):
        sc, ml = _ref_single(x, y, fs, hs, wl)
        scs.append(sc)
        mls.append(ml)
    return sum(scs) / len(scs), sum(mls) / len(mls)


if __name__ == "__main__":
    key = jax.random.PRNGKey(0)
    kx, ky = jax.random.split(key)
    B, T = 2, 256
    x = jax.random.normal(kx, (B, T), dtype=jnp.float32)
    y = jax.random.normal(ky, (B, T), dtype=jnp.float32)

    # Small multi-resolution config; the middle resolution has hop !| n_fft to
    # exercise the general gather-free framing path (same as PyTorch defaults).
    fft_sizes = (64, 128, 32)
    hop_sizes = (16, 48, 8)
    win_lengths = (48, 96, 24)

    sc_loss, mag_loss = multi_resolution_stft_loss(
        x, y, fft_sizes=fft_sizes, hop_sizes=hop_sizes,
        win_lengths=win_lengths)
    sc_loss = jax.block_until_ready(sc_loss)
    mag_loss = jax.block_until_ready(mag_loss)

    sc_ref, mag_ref = _ref_multi(x, y, fft_sizes, hop_sizes, win_lengths)
    np.testing.assert_allclose(np.asarray(sc_loss), np.asarray(sc_ref),
                               rtol=1e-3, atol=1e-4)
    np.testing.assert_allclose(np.asarray(mag_loss), np.asarray(mag_ref),
                               rtol=1e-3, atol=1e-4)

    print("KERNEL_OK")
</pallas_src>

<mosaic_0001>
module attributes {stable_mosaic.version = 11 : i64} {
  func.func @_stft_loss_kernel(%arg0: i32, %arg1: i32, %arg2: memref<2x16x128xf32, #tpu.memory_space<vmem>>, %arg3: memref<128x256xf32, #tpu.memory_space<any>>, %arg4: memref<1x1x128xf32, #tpu.memory_space<vmem>>, %arg5: memref<1x1x128xf32, #tpu.memory_space<vmem>>, %arg6: memref<1x1x128xf32, #tpu.memory_space<vmem>>, %arg7: memref<128x256xf32, #tpu.memory_space<vmem>>) attributes {dimension_semantics = [#tpu.dimension_semantics<parallel>, #tpu.dimension_semantics<arbitrary>], iteration_bounds = array<i64: 1, 1>, scalar_prefetch = 0 : i64, scratch_operands = 1 : i64, tpu.core_type = #tpu.core_type<tc>, window_params = [{transform_indices = @transform_0, window_bounds = array<i64: 2, 16, 128>}, {}, {transform_indices = @transform_2, window_bounds = array<i64: 1, 1, 128>}, {transform_indices = @transform_3, window_bounds = array<i64: 1, 1, 128>}, {transform_indices = @transform_4, window_bounds = array<i64: 1, 1, 128>}]} {
    %c0_i32 = arith.constant 0 : i32
    %0 = arith.cmpi eq, %arg1, %c0_i32 : i32
    %1 = arith.extui %0 : i1 to i32
    %c0_i32_0 = arith.constant 0 : i32
    %2 = arith.cmpi ne, %1, %c0_i32_0 : i32
    scf.if %2 {
      "tpu.region"() ({
        %64 = tpu.sem_alloc : memref<!tpu.dma_semaphore, #tpu.memory_space<semaphore_mem>>
        tpu.enqueue_dma source(%arg3 : memref<128x256xf32, #tpu.memory_space<any>>) target(%arg7 : memref<128x256xf32, #tpu.memory_space<vmem>>) target_semaphore(%64 : memref<!tpu.dma_semaphore, #tpu.memory_space<semaphore_mem>>)
        tpu.wait_dma2 semaphore(%64 : memref<!tpu.dma_semaphore, #tpu.memory_space<semaphore_mem>>) src(%arg3 : memref<128x256xf32, #tpu.memory_space<any>>) dst(%arg7 : memref<128x256xf32, #tpu.memory_space<vmem>>)
        tpu.yield
      }) : () -> ()
      %cst_29 = arith.constant 0.000000e+00 : f32
      %52 = vector.broadcast %cst_29 : f32 to vector<1x128xf32>
      %c0_30 = arith.constant 0 : index
      %c0_31 = arith.constant 0 : index
      %c0_32 = arith.constant 0 : index
      %53 = vector.load %arg4[%c0_30, %c0_31, %c0_32] : memref<1x1x128xf32, #tpu.memory_space<vmem>>, vector<1x1x128xf32>
      %54 = vector.shape_cast %53 : vector<1x1x128xf32> to vector<1x128xf32>
      %55 = vector.shape_cast %52 : vector<1x128xf32> to vector<1x1x128xf32>
      tpu.vector_store %arg4[%c0_30, %c0_31, %c0_32], %55 {strides = array<i32>} : memref<1x1x128xf32, #tpu.memory_space<vmem>>, vector<1x1x128xf32>,
      %cst_33 = arith.constant 0.000000e+00 : f32
      %56 = vector.broadcast %cst_33 : f32 to vector<1x128xf32>
      %c0_34 = arith.constant 0 : index
      %c0_35 = arith.constant 0 : index
      %c0_36 = arith.constant 0 : index
      %57 = vector.load %arg5[%c0_34, %c0_35, %c0_36] : memref<1x1x128xf32, #tpu.memory_space<vmem>>, vector<1x1x128xf32>
      %58 = vector.shape_cast %57 : vector<1x1x128xf32> to vector<1x128xf32>
      %59 = vector.shape_cast %56 : vector<1x128xf32> to vector<1x1x128xf32>
      tpu.vector_store %arg5[%c0_34, %c0_35, %c0_36], %59 {strides = array<i32>} : memref<1x1x128xf32, #tpu.memory_space<vmem>>, vector<1x1x128xf32>,
      %cst_37 = arith.constant 0.000000e+00 : f32
      %60 = vector.broadcast %cst_37 : f32 to vector<1x128xf32>
      %c0_38 = arith.constant 0 : index
      %c0_39 = arith.constant 0 : index
      %c0_40 = arith.constant 0 : index
      %61 = vector.load %arg6[%c0_38, %c0_39, %c0_40] : memref<1x1x128xf32, #tpu.memory_space<vmem>>, vector<1x1x128xf32>
      %62 = vector.shape_cast %61 : vector<1x1x128xf32> to vector<1x128xf32>
      %63 = vector.shape_cast %60 : vector<1x128xf32> to vector<1x1x128xf32>
      tpu.vector_store %arg6[%c0_38, %c0_39, %c0_40], %63 {strides = array<i32>} : memref<1x1x128xf32, #tpu.memory_space<vmem>>, vector<1x1x128xf32>,
    } else {
    }
    %c0 = arith.constant 0 : index
    %c0_1 = arith.constant 0 : index
    %c0_2 = arith.constant 0 : index
    %3 = vector.load %arg2[%c0, %c0_1, %c0_2] : memref<2x16x128xf32, #tpu.memory_space<vmem>>, vector<2x16x128xf32>
    %4 = vector.shape_cast %3 : vector<2x16x128xf32> to vector<32x128xf32>
    %c0_3 = arith.constant 0 : index
    %c0_4 = arith.constant 0 : index
    %5 = vector.load %arg7[%c0_3, %c0_4] : memref<128x256xf32, #tpu.memory_space<vmem>>, vector<128x256xf32>
    %cst = arith.constant dense<0.000000e+00> : vector<32x256xf32>
    %6 = tpu.matmul %4, %5, %cst {dimension_numbers = #tpu.dot_dimension_numbers<[1], [0], [0], [1], [0, 0, 1, 1], [], []>} : vector<32x128xf32>, vector<128x256xf32>, vector<32x256xf32> -> vector<32x256xf32>
    %7 = vector.extract_strided_slice %6 {offsets = [0, 0], sizes = [32, 128], strides = [1, 1]} : vector<32x256xf32> to vector<32x128xf32>
    %8 = vector.extract_strided_slice %6 {offsets = [0, 128], sizes = [32, 128], strides = [1, 1]} : vector<32x256xf32> to vector<32x128xf32>
    %9 = arith.mulf %7, %7 : vector<32x128xf32>
    %10 = arith.mulf %8, %8 : vector<32x128xf32>
    %11 = arith.addf %9, %10 : vector<32x128xf32>
    %cst_5 = arith.constant 1.000000e-07 : f32
    %12 = vector.broadcast %cst_5 : f32 to vector<32x128xf32>
    %13 = arith.maximumf %11, %12 : vector<32x128xf32>
    %14 = vector.extract_strided_slice %13 {offsets = [0, 0], sizes = [16, 128], strides = [1, 1]} : vector<32x128xf32> to vector<16x128xf32>
    %15 = vector.extract_strided_slice %13 {offsets = [16, 0], sizes = [16, 128], strides = [1, 1]} : vector<32x128xf32> to vector<16x128xf32>
    %c0_6 = arith.constant 0 : index
    %c0_7 = arith.constant 0 : index
    %c0_8 = arith.constant 0 : index
    %16 = vector.load %arg4[%c0_6, %c0_7, %c0_8] : memref<1x1x128xf32, #tpu.memory_space<vmem>>, vector<1x1x128xf32>
    %17 = vector.shape_cast %16 : vector<1x1x128xf32> to vector<1x128xf32>
    %18 = arith.addf %14, %15 : vector<16x128xf32>
    %19 = arith.mulf %14, %15 : vector<16x128xf32>
    %20 = math.sqrt %19 : vector<16x128xf32>
    %cst_9 = arith.constant 2.000000e+00 : f32
    %21 = vector.broadcast %cst_9 : f32 to vector<16x128xf32>
    %22 = arith.mulf %21, %20 : vector<16x128xf32>
    %23 = arith.subf %18, %22 : vector<16x128xf32>
    %cst_10 = arith.constant dense<0.000000e+00> : vector<128xf32>
    %24 = vector.multi_reduction <add>, %23, %cst_10 [0] : vector<16x128xf32> to vector<128xf32>
    %25 = vector.shape_cast %24 : vector<128xf32> to vector<1x128xf32>
    %26 = arith.addf %17, %25 : vector<1x128xf32>
    %c0_11 = arith.constant 0 : index
    %c0_12 = arith.constant 0 : index
    %c0_13 = arith.constant 0 : index
    %27 = vector.load %arg4[%c0_11, %c0_12, %c0_13] : memref<1x1x128xf32, #tpu.memory_space<vmem>>, vector<1x1x128xf32>
    %28 = vector.shape_cast %27 : vector<1x1x128xf32> to vector<1x128xf32>
    %29 = vector.shape_cast %26 : vector<1x128xf32> to vector<1x1x128xf32>
    tpu.vector_store %arg4[%c0_11, %c0_12, %c0_13], %29 {strides = array<i32>} : memref<1x1x128xf32, #tpu.memory_space<vmem>>, vector<1x1x128xf32>,
    %c0_14 = arith.constant 0 : index
    %c0_15 = arith.constant 0 : index
    %c0_16 = arith.constant 0 : index
    %30 = vector.load %arg5[%c0_14, %c0_15, %c0_16] : memref<1x1x128xf32, #tpu.memory_space<vmem>>, vector<1x1x128xf32>
    %31 = vector.shape_cast %30 : vector<1x1x128xf32> to vector<1x128xf32>
    %cst_17 = arith.constant dense<0.000000e+00> : vector<128xf32>
    %32 = vector.multi_reduction <add>, %15, %cst_17 [0] : vector<16x128xf32> to vector<128xf32>
    %33 = vector.shape_cast %32 : vector<128xf32> to vector<1x128xf32>
    %34 = arith.addf %31, %33 : vector<1x128xf32>
    %c0_18 = arith.constant 0 : index
    %c0_19 = arith.constant 0 : index
    %c0_20 = arith.constant 0 : index
    %35 = vector.load %arg5[%c0_18, %c0_19, %c0_20] : memref<1x1x128xf32, #tpu.memory_space<vmem>>, vector<1x1x128xf32>
    %36 = vector.shape_cast %35 : vector<1x1x128xf32> to vector<1x128xf32>
    %37 = vector.shape_cast %34 : vector<1x128xf32> to vector<1x1x128xf32>
    tpu.vector_store %arg5[%c0_18, %c0_19, %c0_20], %37 {strides = array<i32>} : memref<1x1x128xf32, #tpu.memory_space<vmem>>, vector<1x1x128xf32>,
    %c0_21 = arith.constant 0 : index
    %c0_22 = arith.constant 0 : index
    %c0_23 = arith.constant 0 : index
    %38 = vector.load %arg6[%c0_21, %c0_22, %c0_23] : memref<1x1x128xf32, #tpu.memory_space<vmem>>, vector<1x1x128xf32>
    %39 = vector.shape_cast %38 : vector<1x1x128xf32> to vector<1x128xf32>
    %40 = math.log %15 : vector<16x128xf32>
    %41 = math.log %14 : vector<16x128xf32>
    %42 = arith.subf %40, %41 : vector<16x128xf32>
    %43 = math.absf %42 : vector<16x128xf32>
    %cst_24 = arith.constant dense<0.000000e+00> : vector<128xf32>
    %44 = vector.multi_reduction <add>, %43, %cst_24 [0] : vector<16x128xf32> to vector<128xf32>
    %45 = vector.shape_cast %44 : vector<128xf32> to vector<1x128xf32>
    %cst_25 = arith.constant 5.000000e-01 : f32
    %46 = vector.broadcast %cst_25 : f32 to vector<1x128xf32>
    %47 = arith.mulf %46, %45 : vector<1x128xf32>
    %48 = arith.addf %39, %47 : vector<1x128xf32>
    %c0_26 = arith.constant 0 : index
    %c0_27 = arith.constant 0 : index
    %c0_28 = arith.constant 0 : index
    %49 = vector.load %arg6[%c0_26, %c0_27, %c0_28] : memref<1x1x128xf32, #tpu.memory_space<vmem>>, vector<1x1x128xf32>
    %50 = vector.shape_cast %49 : vector<1x1x128xf32> to vector<1x128xf32>
    %51 = vector.shape_cast %48 : vector<1x128xf32> to vector<1x1x128xf32>
    tpu.vector_store %arg6[%c0_26, %c0_27, %c0_28], %51 {strides = array<i32>} : memref<1x1x128xf32, #tpu.memory_space<vmem>>, vector<1x1x128xf32>,
    return
  }
  func.func @transform_0(%arg0: i32, %arg1: i32) -> (i32, i32, i32) {
    %c1_i32 = arith.constant 1 : i32
    %0 = arith.muli %arg0, %c1_i32 : i32
    %1 = arith.addi %0, %arg1 : i32
    %c0_i32 = arith.constant 0 : i32
    %c0_i32_0 = arith.constant 0 : i32
    %c0_i32_1 = arith.constant 0 : i32
    return %c0_i32, %1, %c0_i32_0 : i32, i32, i32
  }
  func.func @transform_2(%arg0: i32, %arg1: i32) -> (i32, i32, i32) {
    %c0_i32 = arith.constant 0 : i32
    %c0_i32_0 = arith.constant 0 : i32
    %c0_i32_1 = arith.constant 0 : i32
    return %arg0, %c0_i32, %c0_i32_0 : i32, i32, i32
  }
  func.func @transform_3(%arg0: i32, %arg1: i32) -> (i32, i32, i32) {
    %c0_i32 = arith.constant 0 : i32
    %c0_i32_0 = arith.constant 0 : i32
    %c0_i32_1 = arith.constant 0 : i32
    return %arg0, %c0_i32, %c0_i32_0 : i32, i32, i32
  }
  func.func @transform_4(%arg0: i32, %arg1: i32) -> (i32, i32, i32) {
    %c0_i32 = arith.constant 0 : i32
    %c0_i32_0 = arith.constant 0 : i32
    %c0_i32_1 = arith.constant 0 : i32
    return %arg0, %c0_i32, %c0_i32_0 : i32, i32, i32
  }
}

module attributes {stable_mosaic.version = 11 : i64} {
  func.func @_stft_loss_kernel(%arg0: i32, %arg1: i32, %arg2: memref<2x40x64xf32, #tpu.memory_space<vmem>>, %arg3: memref<64x256xf32, #tpu.memory_space<any>>, %arg4: memref<1x1x128xf32, #tpu.memory_space<vmem>>, %arg5: memref<1x1x128xf32, #tpu.memory_space<vmem>>, %arg6: memref<1x1x128xf32, #tpu.memory_space<vmem>>, %arg7: memref<64x256xf32, #tpu.memory_space<vmem>>) attributes {dimension_semantics = [#tpu.dimension_semantics<parallel>, #tpu.dimension_semantics<arbitrary>], iteration_bounds = array<i64: 1, 1>, scalar_prefetch = 0 : i64, scratch_operands = 1 : i64, tpu.core_type = #tpu.core_type<tc>, window_params = [{transform_indices = @transform_0, window_bounds = array<i64: 2, 40, 64>}, {}, {transform_indices = @transform_2, window_bounds = array<i64: 1, 1, 128>}, {transform_indices = @transform_3, window_bounds = array<i64: 1, 1, 128>}, {transform_indices = @transform_4, window_bounds = array<i64: 1, 1, 128>}]} {
    %c0_i32 = arith.constant 0 : i32
    %0 = arith.cmpi eq, %arg1, %c0_i32 : i32
    %1 = arith.extui %0 : i1 to i32
    %c0_i32_0 = arith.constant 0 : i32
    %2 = arith.cmpi ne, %1, %c0_i32_0 : i32
    scf.if %2 {
      "tpu.region"() ({
        %64 = tpu.sem_alloc : memref<!tpu.dma_semaphore, #tpu.memory_space<semaphore_mem>>
        tpu.enqueue_dma source(%arg3 : memref<64x256xf32, #tpu.memory_space<any>>) target(%arg7 : memref<64x256xf32, #tpu.memory_space<vmem>>) target_semaphore(%64 : memref<!tpu.dma_semaphore, #tpu.memory_space<semaphore_mem>>)
        tpu.wait_dma2 semaphore(%64 : memref<!tpu.dma_semaphore, #tpu.memory_space<semaphore_mem>>) src(%arg3 : memref<64x256xf32, #tpu.memory_space<any>>) dst(%arg7 : memref<64x256xf32, #tpu.memory_space<vmem>>)
        tpu.yield
      }) : () -> ()
      %cst_29 = arith.constant 0.000000e+00 : f32
      %52 = vector.broadcast %cst_29 : f32 to vector<1x128xf32>
      %c0_30 = arith.constant 0 : index
      %c0_31 = arith.constant 0 : index
      %c0_32 = arith.constant 0 : index
      %53 = vector.load %arg4[%c0_30, %c0_31, %c0_32] : memref<1x1x128xf32, #tpu.memory_space<vmem>>, vector<1x1x128xf32>
      %54 = vector.shape_cast %53 : vector<1x1x128xf32> to vector<1x128xf32>
      %55 = vector.shape_cast %52 : vector<1x128xf32> to vector<1x1x128xf32>
      tpu.vector_store %arg4[%c0_30, %c0_31, %c0_32], %55 {strides = array<i32>} : memref<1x1x128xf32, #tpu.memory_space<vmem>>, vector<1x1x128xf32>,
      %cst_33 = arith.constant 0.000000e+00 : f32
      %56 = vector.broadcast %cst_33 : f32 to vector<1x128xf32>
      %c0_34 = arith.constant 0 : index
      %c0_35 = arith.constant 0 : index
      %c0_36 = arith.constant 0 : index
      %57 = vector.load %arg5[%c0_34, %c0_35, %c0_36] : memref<1x1x128xf32, #tpu.memory_space<vmem>>, vector<1x1x128xf32>
      %58 = vector.shape_cast %57 : vector<1x1x128xf32> to vector<1x128xf32>
      %59 = vector.shape_cast %56 : vector<1x128xf32> to vector<1x1x128xf32>
      tpu.vector_store %arg5[%c0_34, %c0_35, %c0_36], %59 {strides = array<i32>} : memref<1x1x128xf32, #tpu.memory_space<vmem>>, vector<1x1x128xf32>,
      %cst_37 = arith.constant 0.000000e+00 : f32
      %60 = vector.broadcast %cst_37 : f32 to vector<1x128xf32>
      %c0_38 = arith.constant 0 : index
      %c0_39 = arith.constant 0 : index
      %c0_40 = arith.constant 0 : index
      %61 = vector.load %arg6[%c0_38, %c0_39, %c0_40] : memref<1x1x128xf32, #tpu.memory_space<vmem>>, vector<1x1x128xf32>
      %62 = vector.shape_cast %61 : vector<1x1x128xf32> to vector<1x128xf32>
      %63 = vector.shape_cast %60 : vector<1x128xf32> to vector<1x1x128xf32>
      tpu.vector_store %arg6[%c0_38, %c0_39, %c0_40], %63 {strides = array<i32>} : memref<1x1x128xf32, #tpu.memory_space<vmem>>, vector<1x1x128xf32>,
    } else {
    }
    %c0 = arith.constant 0 : index
    %c0_1 = arith.constant 0 : index
    %c0_2 = arith.constant 0 : index
    %3 = vector.load %arg2[%c0, %c0_1, %c0_2] : memref<2x40x64xf32, #tpu.memory_space<vmem>>, vector<2x40x64xf32>
    %4 = vector.shape_cast %3 : vector<2x40x64xf32> to vector<80x64xf32>
    %c0_3 = arith.constant 0 : index
    %c0_4 = arith.constant 0 : index
    %5 = vector.load %arg7[%c0_3, %c0_4] : memref<64x256xf32, #tpu.memory_space<vmem>>, vector<64x256xf32>
    %cst = arith.constant dense<0.000000e+00> : vector<80x256xf32>
    %6 = tpu.matmul %4, %5, %cst {dimension_numbers = #tpu.dot_dimension_numbers<[1], [0], [0], [1], [0, 0, 1, 1], [], []>} : vector<80x64xf32>, vector<64x256xf32>, vector<80x256xf32> -> vector<80x256xf32>
    %7 = vector.extract_strided_slice %6 {offsets = [0, 0], sizes = [80, 128], strides = [1, 1]} : vector<80x256xf32> to vector<80x128xf32>
    %8 = vector.extract_strided_slice %6 {offsets = [0, 128], sizes = [80, 128], strides = [1, 1]} : vector<80x256xf32> to vector<80x128xf32>
    %9 = arith.mulf %7, %7 : vector<80x128xf32>
    %10 = arith.mulf %8, %8 : vector<80x128xf32>
    %11 = arith.addf %9, %10 : vector<80x128xf32>
    %cst_5 = arith.constant 1.000000e-07 : f32
    %12 = vector.broadcast %cst_5 : f32 to vector<80x128xf32>
    %13 = arith.maximumf %11, %12 : vector<80x128xf32>
    %14 = vector.extract_strided_slice %13 {offsets = [0, 0], sizes = [40, 128], strides = [1, 1]} : vector<80x128xf32> to vector<40x128xf32>
    %15 = vector.extract_strided_slice %13 {offsets = [40, 0], sizes = [40, 128], strides = [1, 1]} : vector<80x128xf32> to vector<40x128xf32>
    %c0_6 = arith.constant 0 : index
    %c0_7 = arith.constant 0 : index
    %c0_8 = arith.constant 0 : index
    %16 = vector.load %arg4[%c0_6, %c0_7, %c0_8] : memref<1x1x128xf32, #tpu.memory_space<vmem>>, vector<1x1x128xf32>
    %17 = vector.shape_cast %16 : vector<1x1x128xf32> to vector<1x128xf32>
    %18 = arith.addf %14, %15 : vector<40x128xf32>
    %19 = arith.mulf %14, %15 : vector<40x128xf32>
    %20 = math.sqrt %19 : vector<40x128xf32>
    %cst_9 = arith.constant 2.000000e+00 : f32
    %21 = vector.broadcast %cst_9 : f32 to vector<40x128xf32>
    %22 = arith.mulf %21, %20 : vector<40x128xf32>
    %23 = arith.subf %18, %22 : vector<40x128xf32>
    %cst_10 = arith.constant dense<0.000000e+00> : vector<128xf32>
    %24 = vector.multi_reduction <add>, %23, %cst_10 [0] : vector<40x128xf32> to vector<128xf32>
    %25 = vector.shape_cast %24 : vector<128xf32> to vector<1x128xf32>
    %26 = arith.addf %17, %25 : vector<1x128xf32>
    %c0_11 = arith.constant 0 : index
    %c0_12 = arith.constant 0 : index
    %c0_13 = arith.constant 0 : index
    %27 = vector.load %arg4[%c0_11, %c0_12, %c0_13] : memref<1x1x128xf32, #tpu.memory_space<vmem>>, vector<1x1x128xf32>
    %28 = vector.shape_cast %27 : vector<1x1x128xf32> to vector<1x128xf32>
    %29 = vector.shape_cast %26 : vector<1x128xf32> to vector<1x1x128xf32>
    tpu.vector_store %arg4[%c0_11, %c0_12, %c0_13], %29 {strides = array<i32>} : memref<1x1x128xf32, #tpu.memory_space<vmem>>, vector<1x1x128xf32>,
    %c0_14 = arith.constant 0 : index
    %c0_15 = arith.constant 0 : index
    %c0_16 = arith.constant 0 : index
    %30 = vector.load %arg5[%c0_14, %c0_15, %c0_16] : memref<1x1x128xf32, #tpu.memory_space<vmem>>, vector<1x1x128xf32>
    %31 = vector.shape_cast %30 : vector<1x1x128xf32> to vector<1x128xf32>
    %cst_17 = arith.constant dense<0.000000e+00> : vector<128xf32>
    %32 = vector.multi_reduction <add>, %15, %cst_17 [0] : vector<40x128xf32> to vector<128xf32>
    %33 = vector.shape_cast %32 : vector<128xf32> to vector<1x128xf32>
    %34 = arith.addf %31, %33 : vector<1x128xf32>
    %c0_18 = arith.constant 0 : index
    %c0_19 = arith.constant 0 : index
    %c0_20 = arith.constant 0 : index
    %35 = vector.load %arg5[%c0_18, %c0_19, %c0_20] : memref<1x1x128xf32, #tpu.memory_space<vmem>>, vector<1x1x128xf32>
    %36 = vector.shape_cast %35 : vector<1x1x128xf32> to vector<1x128xf32>
    %37 = vector.shape_cast %34 : vector<1x128xf32> to vector<1x1x128xf32>
    tpu.vector_store %arg5[%c0_18, %c0_19, %c0_20], %37 {strides = array<i32>} : memref<1x1x128xf32, #tpu.memory_space<vmem>>, vector<1x1x128xf32>,
    %c0_21 = arith.constant 0 : index
    %c0_22 = arith.constant 0 : index
    %c0_23 = arith.constant 0 : index
    %38 = vector.load %arg6[%c0_21, %c0_22, %c0_23] : memref<1x1x128xf32, #tpu.memory_space<vmem>>, vector<1x1x128xf32>
    %39 = vector.shape_cast %38 : vector<1x1x128xf32> to vector<1x128xf32>
    %40 = math.log %15 : vector<40x128xf32>
    %41 = math.log %14 : vector<40x128xf32>
    %42 = arith.subf %40, %41 : vector<40x128xf32>
    %43 = math.absf %42 : vector<40x128xf32>
    %cst_24 = arith.constant dense<0.000000e+00> : vector<128xf32>
    %44 = vector.multi_reduction <add>, %43, %cst_24 [0] : vector<40x128xf32> to vector<128xf32>
    %45 = vector.shape_cast %44 : vector<128xf32> to vector<1x128xf32>
    %cst_25 = arith.constant 5.000000e-01 : f32
    %46 = vector.broadcast %cst_25 : f32 to vector<1x128xf32>
    %47 = arith.mulf %46, %45 : vector<1x128xf32>
    %48 = arith.addf %39, %47 : vector<1x128xf32>
    %c0_26 = arith.constant 0 : index
    %c0_27 = arith.constant 0 : index
    %c0_28 = arith.constant 0 : index
    %49 = vector.load %arg6[%c0_26, %c0_27, %c0_28] : memref<1x1x128xf32, #tpu.memory_space<vmem>>, vector<1x1x128xf32>
    %50 = vector.shape_cast %49 : vector<1x1x128xf32> to vector<1x128xf32>
    %51 = vector.shape_cast %48 : vector<1x128xf32> to vector<1x1x128xf32>
    tpu.vector_store %arg6[%c0_26, %c0_27, %c0_28], %51 {strides = array<i32>} : memref<1x1x128xf32, #tpu.memory_space<vmem>>, vector<1x1x128xf32>,
    return
  }
  func.func @transform_0(%arg0: i32, %arg1: i32) -> (i32, i32, i32) {
    %c1_i32 = arith.constant 1 : i32
    %0 = arith.muli %arg0, %c1_i32 : i32
    %1 = arith.addi %0, %arg1 : i32
    %c0_i32 = arith.constant 0 : i32
    %c0_i32_0 = arith.constant 0 : i32
    %c0_i32_1 = arith.constant 0 : i32
    return %c0_i32, %1, %c0_i32_0 : i32, i32, i32
  }
  func.func @transform_2(%arg0: i32, %arg1: i32) -> (i32, i32, i32) {
    %c0_i32 = arith.constant 0 : i32
    %c0_i32_0 = arith.constant 0 : i32
    %c0_i32_1 = arith.constant 0 : i32
    return %arg0, %c0_i32, %c0_i32_0 : i32, i32, i32
  }
  func.func @transform_3(%arg0: i32, %arg1: i32) -> (i32, i32, i32) {
    %c0_i32 = arith.constant 0 : i32
    %c0_i32_0 = arith.constant 0 : i32
    %c0_i32_1 = arith.constant 0 : i32
    return %arg0, %c0_i32, %c0_i32_0 : i32, i32, i32
  }
  func.func @transform_4(%arg0: i32, %arg1: i32) -> (i32, i32, i32) {
    %c0_i32 = arith.constant 0 : i32
    %c0_i32_0 = arith.constant 0 : i32
    %c0_i32_1 = arith.constant 0 : i32
    return %arg0, %c0_i32, %c0_i32_0 : i32, i32, i32
  }
}

module attributes {stable_mosaic.version = 11 : i64} {
  func.func @_stft_loss_kernel(%arg0: i32, %arg1: i32, %arg2: memref<2x72x32xf32, #tpu.memory_space<vmem>>, %arg3: memref<32x256xf32, #tpu.memory_space<any>>, %arg4: memref<1x1x128xf32, #tpu.memory_space<vmem>>, %arg5: memref<1x1x128xf32, #tpu.memory_space<vmem>>, %arg6: memref<1x1x128xf32, #tpu.memory_space<vmem>>, %arg7: memref<32x256xf32, #tpu.memory_space<vmem>>) attributes {dimension_semantics = [#tpu.dimension_semantics<parallel>, #tpu.dimension_semantics<arbitrary>], iteration_bounds = array<i64: 1, 1>, scalar_prefetch = 0 : i64, scratch_operands = 1 : i64, tpu.core_type = #tpu.core_type<tc>, window_params = [{transform_indices = @transform_0, window_bounds = array<i64: 2, 72, 32>}, {}, {transform_indices = @transform_2, window_bounds = array<i64: 1, 1, 128>}, {transform_indices = @transform_3, window_bounds = array<i64: 1, 1, 128>}, {transform_indices = @transform_4, window_bounds = array<i64: 1, 1, 128>}]} {
    %c0_i32 = arith.constant 0 : i32
    %0 = arith.cmpi eq, %arg1, %c0_i32 : i32
    %1 = arith.extui %0 : i1 to i32
    %c0_i32_0 = arith.constant 0 : i32
    %2 = arith.cmpi ne, %1, %c0_i32_0 : i32
    scf.if %2 {
      "tpu.region"() ({
        %64 = tpu.sem_alloc : memref<!tpu.dma_semaphore, #tpu.memory_space<semaphore_mem>>
        tpu.enqueue_dma source(%arg3 : memref<32x256xf32, #tpu.memory_space<any>>) target(%arg7 : memref<32x256xf32, #tpu.memory_space<vmem>>) target_semaphore(%64 : memref<!tpu.dma_semaphore, #tpu.memory_space<semaphore_mem>>)
        tpu.wait_dma2 semaphore(%64 : memref<!tpu.dma_semaphore, #tpu.memory_space<semaphore_mem>>) src(%arg3 : memref<32x256xf32, #tpu.memory_space<any>>) dst(%arg7 : memref<32x256xf32, #tpu.memory_space<vmem>>)
        tpu.yield
      }) : () -> ()
      %cst_29 = arith.constant 0.000000e+00 : f32
      %52 = vector.broadcast %cst_29 : f32 to vector<1x128xf32>
      %c0_30 = arith.constant 0 : index
      %c0_31 = arith.constant 0 : index
      %c0_32 = arith.constant 0 : index
      %53 = vector.load %arg4[%c0_30, %c0_31, %c0_32] : memref<1x1x128xf32, #tpu.memory_space<vmem>>, vector<1x1x128xf32>
      %54 = vector.shape_cast %53 : vector<1x1x128xf32> to vector<1x128xf32>
      %55 = vector.shape_cast %52 : vector<1x128xf32> to vector<1x1x128xf32>
      tpu.vector_store %arg4[%c0_30, %c0_31, %c0_32], %55 {strides = array<i32>} : memref<1x1x128xf32, #tpu.memory_space<vmem>>, vector<1x1x128xf32>,
      %cst_33 = arith.constant 0.000000e+00 : f32
      %56 = vector.broadcast %cst_33 : f32 to vector<1x128xf32>
      %c0_34 = arith.constant 0 : index
      %c0_35 = arith.constant 0 : index
      %c0_36 = arith.constant 0 : index
      %57 = vector.load %arg5[%c0_34, %c0_35, %c0_36] : memref<1x1x128xf32, #tpu.memory_space<vmem>>, vector<1x1x128xf32>
      %58 = vector.shape_cast %57 : vector<1x1x128xf32> to vector<1x128xf32>
      %59 = vector.shape_cast %56 : vector<1x128xf32> to vector<1x1x128xf32>
      tpu.vector_store %arg5[%c0_34, %c0_35, %c0_36], %59 {strides = array<i32>} : memref<1x1x128xf32, #tpu.memory_space<vmem>>, vector<1x1x128xf32>,
      %cst_37 = arith.constant 0.000000e+00 : f32
      %60 = vector.broadcast %cst_37 : f32 to vector<1x128xf32>
      %c0_38 = arith.constant 0 : index
      %c0_39 = arith.constant 0 : index
      %c0_40 = arith.constant 0 : index
      %61 = vector.load %arg6[%c0_38, %c0_39, %c0_40] : memref<1x1x128xf32, #tpu.memory_space<vmem>>, vector<1x1x128xf32>
      %62 = vector.shape_cast %61 : vector<1x1x128xf32> to vector<1x128xf32>
      %63 = vector.shape_cast %60 : vector<1x128xf32> to vector<1x1x128xf32>
      tpu.vector_store %arg6[%c0_38, %c0_39, %c0_40], %63 {strides = array<i32>} : memref<1x1x128xf32, #tpu.memory_space<vmem>>, vector<1x1x128xf32>,
    } else {
    }
    %c0 = arith.constant 0 : index
    %c0_1 = arith.constant 0 : index
    %c0_2 = arith.constant 0 : index
    %3 = vector.load %arg2[%c0, %c0_1, %c0_2] : memref<2x72x32xf32, #tpu.memory_space<vmem>>, vector<2x72x32xf32>
    %4 = vector.shape_cast %3 : vector<2x72x32xf32> to vector<144x32xf32>
    %c0_3 = arith.constant 0 : index
    %c0_4 = arith.constant 0 : index
    %5 = vector.load %arg7[%c0_3, %c0_4] : memref<32x256xf32, #tpu.memory_space<vmem>>, vector<32x256xf32>
    %cst = arith.constant dense<0.000000e+00> : vector<144x256xf32>
    %6 = tpu.matmul %4, %5, %cst {dimension_numbers = #tpu.dot_dimension_numbers<[1], [0], [0], [1], [0, 0, 1, 1], [], []>} : vector<144x32xf32>, vector<32x256xf32>, vector<144x256xf32> -> vector<144x256xf32>
    %7 = vector.extract_strided_slice %6 {offsets = [0, 0], sizes = [144, 128], strides = [1, 1]} : vector<144x256xf32> to vector<144x128xf32>
    %8 = vector.extract_strided_slice %6 {offsets = [0, 128], sizes = [144, 128], strides = [1, 1]} : vector<144x256xf32> to vector<144x128xf32>
    %9 = arith.mulf %7, %7 : vector<144x128xf32>
    %10 = arith.mulf %8, %8 : vector<144x128xf32>
    %11 = arith.addf %9, %10 : vector<144x128xf32>
    %cst_5 = arith.constant 1.000000e-07 : f32
    %12 = vector.broadcast %cst_5 : f32 to vector<144x128xf32>
    %13 = arith.maximumf %11, %12 : vector<144x128xf32>
    %14 = vector.extract_strided_slice %13 {offsets = [0, 0], sizes = [72, 128], strides = [1, 1]} : vector<144x128xf32> to vector<72x128xf32>
    %15 = vector.extract_strided_slice %13 {offsets = [72, 0], sizes = [72, 128], strides = [1, 1]} : vector<144x128xf32> to vector<72x128xf32>
    %c0_6 = arith.constant 0 : index
    %c0_7 = arith.constant 0 : index
    %c0_8 = arith.constant 0 : index
    %16 = vector.load %arg4[%c0_6, %c0_7, %c0_8] : memref<1x1x128xf32, #tpu.memory_space<vmem>>, vector<1x1x128xf32>
    %17 = vector.shape_cast %16 : vector<1x1x128xf32> to vector<1x128xf32>
    %18 = arith.addf %14, %15 : vector<72x128xf32>
    %19 = arith.mulf %14, %15 : vector<72x128xf32>
    %20 = math.sqrt %19 : vector<72x128xf32>
    %cst_9 = arith.constant 2.000000e+00 : f32
    %21 = vector.broadcast %cst_9 : f32 to vector<72x128xf32>
    %22 = arith.mulf %21, %20 : vector<72x128xf32>
    %23 = arith.subf %18, %22 : vector<72x128xf32>
    %cst_10 = arith.constant dense<0.000000e+00> : vector<128xf32>
    %24 = vector.multi_reduction <add>, %23, %cst_10 [0] : vector<72x128xf32> to vector<128xf32>
    %25 = vector.shape_cast %24 : vector<128xf32> to vector<1x128xf32>
    %26 = arith.addf %17, %25 : vector<1x128xf32>
    %c0_11 = arith.constant 0 : index
    %c0_12 = arith.constant 0 : index
    %c0_13 = arith.constant 0 : index
    %27 = vector.load %arg4[%c0_11, %c0_12, %c0_13] : memref<1x1x128xf32, #tpu.memory_space<vmem>>, vector<1x1x128xf32>
    %28 = vector.shape_cast %27 : vector<1x1x128xf32> to vector<1x128xf32>
    %29 = vector.shape_cast %26 : vector<1x128xf32> to vector<1x1x128xf32>
    tpu.vector_store %arg4[%c0_11, %c0_12, %c0_13], %29 {strides = array<i32>} : memref<1x1x128xf32, #tpu.memory_space<vmem>>, vector<1x1x128xf32>,
    %c0_14 = arith.constant 0 : index
    %c0_15 = arith.constant 0 : index
    %c0_16 = arith.constant 0 : index
    %30 = vector.load %arg5[%c0_14, %c0_15, %c0_16] : memref<1x1x128xf32, #tpu.memory_space<vmem>>, vector<1x1x128xf32>
    %31 = vector.shape_cast %30 : vector<1x1x128xf32> to vector<1x128xf32>
    %cst_17 = arith.constant dense<0.000000e+00> : vector<128xf32>
    %32 = vector.multi_reduction <add>, %15, %cst_17 [0] : vector<72x128xf32> to vector<128xf32>
    %33 = vector.shape_cast %32 : vector<128xf32> to vector<1x128xf32>
    %34 = arith.addf %31, %33 : vector<1x128xf32>
    %c0_18 = arith.constant 0 : index
    %c0_19 = arith.constant 0 : index
    %c0_20 = arith.constant 0 : index
    %35 = vector.load %arg5[%c0_18, %c0_19, %c0_20] : memref<1x1x128xf32, #tpu.memory_space<vmem>>, vector<1x1x128xf32>
    %36 = vector.shape_cast %35 : vector<1x1x128xf32> to vector<1x128xf32>
    %37 = vector.shape_cast %34 : vector<1x128xf32> to vector<1x1x128xf32>
    tpu.vector_store %arg5[%c0_18, %c0_19, %c0_20], %37 {strides = array<i32>} : memref<1x1x128xf32, #tpu.memory_space<vmem>>, vector<1x1x128xf32>,
    %c0_21 = arith.constant 0 : index
    %c0_22 = arith.constant 0 : index
    %c0_23 = arith.constant 0 : index
    %38 = vector.load %arg6[%c0_21, %c0_22, %c0_23] : memref<1x1x128xf32, #tpu.memory_space<vmem>>, vector<1x1x128xf32>
    %39 = vector.shape_cast %38 : vector<1x1x128xf32> to vector<1x128xf32>
    %40 = math.log %15 : vector<72x128xf32>
    %41 = math.log %14 : vector<72x128xf32>
    %42 = arith.subf %40, %41 : vector<72x128xf32>
    %43 = math.absf %42 : vector<72x128xf32>
    %cst_24 = arith.constant dense<0.000000e+00> : vector<128xf32>
    %44 = vector.multi_reduction <add>, %43, %cst_24 [0] : vector<72x128xf32> to vector<128xf32>
    %45 = vector.shape_cast %44 : vector<128xf32> to vector<1x128xf32>
    %cst_25 = arith.constant 5.000000e-01 : f32
    %46 = vector.broadcast %cst_25 : f32 to vector<1x128xf32>
    %47 = arith.mulf %46, %45 : vector<1x128xf32>
    %48 = arith.addf %39, %47 : vector<1x128xf32>
    %c0_26 = arith.constant 0 : index
    %c0_27 = arith.constant 0 : index
    %c0_28 = arith.constant 0 : index
    %49 = vector.load %arg6[%c0_26, %c0_27, %c0_28] : memref<1x1x128xf32, #tpu.memory_space<vmem>>, vector<1x1x128xf32>
    %50 = vector.shape_cast %49 : vector<1x1x128xf32> to vector<1x128xf32>
    %51 = vector.shape_cast %48 : vector<1x128xf32> to vector<1x1x128xf32>
    tpu.vector_store %arg6[%c0_26, %c0_27, %c0_28], %51 {strides = array<i32>} : memref<1x1x128xf32, #tpu.memory_space<vmem>>, vector<1x1x128xf32>,
    return
  }
  func.func @transform_0(%arg0: i32, %arg1: i32) -> (i32, i32, i32) {
    %c1_i32 = arith.constant 1 : i32
    %0 = arith.muli %arg0, %c1_i32 : i32
    %1 = arith.addi %0, %arg1 : i32
    %c0_i32 = arith.constant 0 : i32
    %c0_i32_0 = arith.constant 0 : i32
    %c0_i32_1 = arith.constant 0 : i32
    return %c0_i32, %1, %c0_i32_0 : i32, i32, i32
  }
  func.func @transform_2(%arg0: i32, %arg1: i32) -> (i32, i32, i32) {
    %c0_i32 = arith.constant 0 : i32
    %c0_i32_0 = arith.constant 0 : i32
    %c0_i32_1 = arith.constant 0 : i32
    return %arg0, %c0_i32, %c0_i32_0 : i32, i32, i32
  }
  func.func @transform_3(%arg0: i32, %arg1: i32) -> (i32, i32, i32) {
    %c0_i32 = arith.constant 0 : i32
    %c0_i32_0 = arith.constant 0 : i32
    %c0_i32_1 = arith.constant 0 : i32
    return %arg0, %c0_i32, %c0_i32_0 : i32, i32, i32
  }
  func.func @transform_4(%arg0: i32, %arg1: i32) -> (i32, i32, i32) {
    %c0_i32 = arith.constant 0 : i32
    %c0_i32_0 = arith.constant 0 : i32
    %c0_i32_1 = arith.constant 0 : i32
    return %arg0, %c0_i32, %c0_i32_0 : i32, i32, i32
  }
}

</mosaic_0001>

<bundles_post_ra>
// kernel: multi_resolution_stft_loss.3
= control target key start
LH: loop header
LB: loop body
LE: loop exit
PB: predicated region body
PF: predicated region fallthrough
CT: control target
= control target key end

     0   :  { %s787_s0 = inlined_call_operand.vmem [shape: f32[2,40,64], index: 0, kind: input, shape index: {}]   ;;  %s788_s1 = inlined_call_operand.vmem [shape: f32[64,256], index: 1, kind: input, shape index: {}]   ;;  %s789_s2 = inlined_call_operand.vmem [shape: f32[1,1,128], index: 2, kind: output, shape index: {0}]   ;;  %s790_s3 = inlined_call_operand.vmem [shape: f32[1,1,128], index: 3, kind: output, shape index: {1}]   ;;  %s791_s4 = inlined_call_operand.vmem [shape: f32[1,1,128], index: 4, kind: output, shape index: {2}]  }
   0x1   :  { %v48_v0 = vld [vmem:[%s788_s1] sm:$0xff]  ;;  %v50_v1 = vld [vmem:[%s788_s1 + $0x8] sm:$0xff]  ;;  %v52_v2 = vld [vmem:[%s788_s1 + $0x10] sm:$0xff] }
   0x2   :  { %v54_v3 = vld [vmem:[%s788_s1 + $0x18] sm:$0xff]  ;;  %v56_v4 = vld [vmem:[%s788_s1 + $0x20] sm:$0xff]  ;;  %v58_v5 = vld [vmem:[%s788_s1 + $0x28] sm:$0xff] }
   0x3   :  { %v60_v6 = vld [vmem:[%s788_s1 + $0x30] sm:$0xff]  ;;  %v62_v7 = vld [vmem:[%s788_s1 + $0x38] sm:$0xff]  ;;  %v64_v8 = vld [vmem:[%s788_s1 + $0x40] sm:$0xff] }
   0x4   :  { %v66_v9 = vld [vmem:[%s788_s1 + $0x48] sm:$0xff]  ;;  %v68_v10 = vld [vmem:[%s788_s1 + $0x50] sm:$0xff]  ;;  %v70_v11 = vld [vmem:[%s788_s1 + $0x58] sm:$0xff] }
   0x5   :  { %v72_v12 = vld [vmem:[%s788_s1 + $0x60] sm:$0xff]  ;;  %v74_v13 = vld [vmem:[%s788_s1 + $0x68] sm:$0xff]  ;;  %v76_v14 = vld [vmem:[%s788_s1 + $0x70] sm:$0xff] }
   0x6   :  { %v78_v15 = vld [vmem:[%s788_s1 + $0x78] sm:$0xff] }
   0x7   :  { %85 = vsyncadd [#allocation3], 2048 }
   0x8   :  { %523 = dma.done.wait [#allocation3], 2048 }
   0x9   :  { %524 = vsyncadd [#allocation3], 4294965248  ;;  %476 = vmatpush.msra.mxu2 %v76_v14  ;;  %484 = vmatpush.msra.mxu3 %v78_v15  ;;  %v98_v16 = vld [vmem:[%s787_s0 + $0x28] sm:$0xff]  ;;  %vm119_vm0 = vcmask 523264   ;;  %v93_v17 = vld [vmem:[%s787_s0] sm:$0xff] }
   0xa   :  { %158 = vmatpush.msra.mxu0 %v76_v14  ;;  %205 = vmatpush.msra.mxu1 %v78_v15  ;;  %v99_v18 = vld [vmem:[%s787_s0 + $0x30] sm:$0xff]  ;;  %v94_v19 = vld [vmem:[%s787_s0 + $0x8] sm:$0xff]  ;;  %v100_v20 = vld [vmem:[%s787_s0 + $0x38] sm:$0xff] }
   0xb   :  { %477 = vmatpush.msra.mxu2 %v72_v12  ;;  %485 = vmatpush.msra.mxu3 %v74_v13  ;;  %v95_v21 = vld [vmem:[%s787_s0 + $0x10] sm:$0xff]  ;;  %v101_v22 = vld [vmem:[%s787_s0 + $0x40] sm:$0xff]  ;;  %v96_v23 = vld [vmem:[%s787_s0 + $0x18] sm:$0xff] }
   0xc   :  { %159 = vmatpush.msra.mxu0 %v72_v12  ;;  %206 = vmatpush.msra.mxu1 %v74_v13  ;;  %v102_v24 = vld [vmem:[%s787_s0 + $0x48] sm:$0xff]  ;;  %v97_v25 = vld [vmem:[%s787_s0 + $0x20] sm:$0xff] }
   0xd   :  { %478 = vmatpush.msra.mxu2 %v68_v10  ;;  %486 = vmatpush.msra.mxu3 %v70_v11 }
   0xe   :  { %160 = vmatpush.msra.mxu0 %v68_v10  ;;  %207 = vmatpush.msra.mxu1 %v70_v11 }
   0xf   :  { %479 = vmatpush.msra.mxu2 %v64_v8  ;;  %487 = vmatpush.msra.mxu3 %v66_v9 }
  0x10   :  { %161 = vmatpush.msra.mxu0 %v64_v8  ;;  %208 = vmatpush.msra.mxu1 %v66_v9 }
  0x11   :  { %480 = vmatpush.msra.mxu2 %v60_v6  ;;  %488 = vmatpush.msra.mxu3 %v62_v7 }
  0x12   :  { %162 = vmatpush.msra.mxu0 %v60_v6  ;;  %209 = vmatpush.msra.mxu1 %v62_v7 }
  0x13   :  { %481 = vmatpush.msra.mxu2 %v56_v4  ;;  %489 = vmatpush.msra.mxu3 %v58_v5 }
  0x14   :  { %163 = vmatpush.msra.mxu0 %v56_v4  ;;  %210 = vmatpush.msra.mxu1 %v58_v5 }
  0x15   :  { %482 = vmatpush.msra.mxu2 %v52_v2  ;;  %490 = vmatpush.msra.mxu3 %v54_v3 }
  0x16   :  { %164 = vmatpush.msra.mxu0 %v52_v2  ;;  %211 = vmatpush.msra.mxu1 %v54_v3  ;;  %v525_v3 = vmov 0.0  }
  0x17   :  { %483 = vmatpush.msra.mxu2 %v48_v0  ;;  %491 = vmatpush.msra.mxu3 %v50_v1  ;;  %90 = vst [vmem:[%s789_s2] sm:$0x1] %v525_v3 }
  0x18   :  { %461 = vmatmul.msk.f32.vlgmr.msra.gmra.mxu2 %vm119_vm0, %v98_v16  ;;  %471 = vmatmul.msk.f32.vlgmr.msra.gmra.mxu3 %vm119_vm0, %v98_v16  ;;  %91 = vst [vmem:[%s790_s3] sm:$0x1] %v525_v3 }
  0x19   :  { %165 = vmatpush.msra.mxu0 %v48_v0  ;;  %212 = vmatpush.msra.mxu1 %v50_v1  ;;  %92 = vst [vmem:[%s791_s4] sm:$0x1] %v525_v3 }
  0x1a   :  { %456 = vmatmul.msk.f32.vlgmr.msra.gmra.mxu0 %vm119_vm0, %v93_v17  ;;  %466 = vmatmul.msk.f32.vlgmr.msra.gmra.mxu1 %vm119_vm0, %v93_v17 }
  0x20   :  { %462 = vmatmul.msk.f32.gmra.mxu2 %vm119_vm0, %v99_v18  ;;  %472 = vmatmul.msk.f32.gmra.mxu3 %vm119_vm0, %v99_v18 }
  0x22   :  { %457 = vmatmul.msk.f32.gmra.mxu0 %vm119_vm0, %v94_v19  ;;  %467 = vmatmul.msk.f32.gmra.mxu1 %vm119_vm0, %v94_v19 }
  0x28   :  { %463 = vmatmul.msk.f32.gmra.mxu2 %vm119_vm0, %v100_v20  ;;  %473 = vmatmul.msk.f32.gmra.mxu3 %vm119_vm0, %v100_v20 }
  0x2a   :  { %458 = vmatmul.msk.f32.gmra.mxu0 %vm119_vm0, %v95_v21  ;;  %468 = vmatmul.msk.f32.gmra.mxu1 %vm119_vm0, %v95_v21 }
  0x30   :  { %464 = vmatmul.msk.f32.gmra.mxu2 %vm119_vm0, %v101_v22  ;;  %474 = vmatmul.msk.f32.gmra.mxu3 %vm119_vm0, %v101_v22 }
  0x32   :  { %459 = vmatmul.msk.f32.gmra.mxu0 %vm119_vm0, %v96_v23  ;;  %469 = vmatmul.msk.f32.gmra.mxu1 %vm119_vm0, %v96_v23 }
  0x38   :  { %465 = vmatmul.msk.f32.gmra.mxu2 %vm119_vm0, %v102_v24  ;;  %475 = vmatmul.msk.f32.gmra.mxu3 %vm119_vm0, %v102_v24 }
  0x3a   :  { %460 = vmatmul.msk.f32.gmra.mxu0 %vm119_vm0, %v97_v25  ;;  %470 = vmatmul.msk.f32.gmra.mxu1 %vm119_vm0, %v97_v25 }
  0x97   :  { %v167_v26 = vpop.f32.mrf.mxu0  ;;  %v214_v27 = vpop.f32.mrf.mxu1 }
  0x98   :  { %v244_v28 = vmul.f32 %v167_v26, %v167_v26  ;;  %v254_v29 = vmul.f32 %v214_v27, %v214_v27 }
  0x9a   :  { %v264_v30 = vadd.f32 %v254_v29, %v244_v28 }
  0x9b   :  { %v182_v31 = vpop.f32.mrf.mxu2  ;;  %v229_v32 = vpop.f32.mrf.mxu3 }
  0x9c   :  { %v249_v33 = vmul.f32 %v182_v31, %v182_v31  ;;  %v259_v34 = vmul.f32 %v229_v32, %v229_v32  ;;  %v649_v35 = vmax.f32 %v264_v30, 1e-07 }
  0x9e   :  { %v269_v36 = vadd.f32 %v259_v34, %v249_v33 }
  0x9f   :  { %v170_v37 = vpop.f32.mrf.mxu0  ;;  %v217_v38 = vpop.f32.mrf.mxu1 }
  0xa0   :  { %v651_v39 = vmax.f32 %v269_v36, 1e-07  ;;  %v245_v40 = vmul.f32 %v170_v37, %v170_v37  ;;  %v255_v41 = vmul.f32 %v217_v38, %v217_v38 }
  0xa2   :  { %v655_v42 = vmul.f32 %v651_v39, %v649_v35  ;;  %v265_v44 = vadd.f32 %v255_v41, %v245_v40 }
  0xa3   :  { %v185_v43 = vpop.f32.mrf.mxu2  ;;  %v232_v45 = vpop.f32.mrf.mxu3 }
  0xa4   :  { %v250_v46 = vmul.f32 %v185_v43, %v185_v43  ;;  %v260_v47 = vmul.f32 %v232_v45, %v232_v45  ;;  %493 = vrsqrt.f32 %v655_v42  ;;  %v658_v48 = vmax.f32 %v265_v44, 1e-07 }
  0xa5   :  { %vm302_vm1 = vcmp.eq.f32.partialorder %v655_v42, inf  ;;  %vm304_vm2 = vcmp.eq.f32.partialorder %v655_v42, 0.0 }
  0xa6   :  { %v270_v49 = vadd.f32 %v260_v47, %v250_v46 }
  0xa7   :  { %v173_v50 = vpop.f32.mrf.mxu0  ;;  %v220_v51 = vpop.f32.mrf.mxu1 }
  0xa8   :  { %v660_v52 = vmax.f32 %v270_v49, 1e-07  ;;  %v246_v53 = vmul.f32 %v173_v50, %v173_v50  ;;  %v256_v54 = vmul.f32 %v220_v51, %v220_v51 }
  0xaa   :  { %v664_v55 = vmul.f32 %v660_v52, %v658_v48  ;;  %v494_v58 = vpop.eup %493  ;;  %v266_v60 = vadd.f32 %v256_v54, %v246_v53  ;;  %v378_v50 = vadd.f32 %v660_v52, %v651_v39 }
  0xab   :  { %v188_v56 = vpop.f32.mrf.mxu2  ;;  %v235_v57 = vpop.f32.mrf.mxu3  ;;  %v296_v61 = vmul.f32 %v494_v58, %v655_v42 }
  0xac   :  { %495 = vrsqrt.f32 %v664_v55  ;;  %v251_v59 = vmul.f32 %v188_v56, %v188_v56  ;;  %v261_v62 = vmul.f32 %v235_v57, %v235_v57  ;;  %v674_v5 = vmax.f32 %v266_v60, 1e-07 }
  0xad   :  { %v297_v7 = vmul.f32 %v494_v58, %v296_v61  ;;  %497 = vlog2.f32 %v649_v35  ;;  %vm314_vm3 = vcmp.eq.f32.partialorder %v664_v55, inf  ;;  %vm316_vm4 = vcmp.eq.f32.partialorder %v664_v55, 0.0 }
  0xae   :  { %v271_v4 = vadd.f32 %v261_v62, %v251_v59  ;;  %499 = vlog2.f32 %v658_v48 }
  0xaf   :  { %v176_v63 = vpop.f32.mrf.mxu0  ;;  %v223_v0 = vpop.f32.mrf.mxu1  ;;  %v298_v16 = vmul.f32 0.5, %v297_v7  ;;  %501 = vlog2.f32 %v660_v52 }
  0xb0   :  { %v247_v1 = vmul.f32 %v176_v63, %v176_v63  ;;  %v257_v2 = vmul.f32 %v223_v0, %v223_v0  ;;  %v681_v8 = vmax.f32 %v271_v4, 1e-07 }
  0xb1   :  { %v299_v26 = vsub.f32 1.5, %v298_v16 }
  0xb2   :  { %v679_v6 = vpop.eup %495  ;;  %v267_v12 = vadd.f32 %v257_v2, %v247_v1  ;;  %v689_v15 = vmul.f32 %v681_v8, %v674_v5  ;;  %v379_v61 = vadd.f32 %v378_v50, %v681_v8 }
  0xb3   :  { %v191_v9 = vpop.f32.mrf.mxu2  ;;  %v238_v10 = vpop.f32.mrf.mxu3  ;;  %v308_v14 = vmul.f32 %v679_v6, %v664_v55  ;;  %v300_v38 = vmul.f32 %v494_v58, %v299_v26 }
  0xb4   :  { %v252_v11 = vmul.f32 %v191_v9, %v191_v9  ;;  %v262_v13 = vmul.f32 %v238_v10, %v238_v10  ;;  %503 = vrsqrt.f32 %v689_v15  ;;  %v693_v20 = vmax.f32 %v267_v12, 1e-07  ;;  %v498_v25 = vpop.eup %497 }
  0xb5   :  { %505 = vlog2.f32 %v651_v39  ;;  %v309_v21 = vmul.f32 %v679_v6, %v308_v14  ;;  %v500_v28 = vpop.eup %499  ;;  %v402_v54 = vmul.f32 0.6931472, %v498_v25  ;;  %v301_v59 = vmul.f32 %v300_v38, %v655_v42 }
  0xb6   :  { %v272_v17 = vadd.f32 %v262_v13, %v252_v11  ;;  %507 = vlog2.f32 %v674_v5  ;;  %v502_v30 = vpop.eup %501  ;;  %v404_v43 = vmul.f32 0.6931472, %v500_v28  ;;  %vm326_vm5 = vcmp.eq.f32.partialorder %v689_v15, inf }
  0xb7   :  { %v179_v18 = vpop.f32.mrf.mxu0  ;;  %v226_v19 = vpop.f32.mrf.mxu1  ;;  %509 = vlog2.f32 %v681_v8  ;;  %v310_v31 = vmul.f32 0.5, %v309_v21  ;;  %v394_v44 = vmul.f32 0.6931472, %v502_v30  ;;  %v303_v21 = vsel %vm302_vm1, %v655_v42, %v301_v59 }
  0xb8   :  { %v698_v22 = vmax.f32 %v272_v17, 1e-07  ;;  %v248_v23 = vmul.f32 %v179_v18, %v179_v18  ;;  %v258_v24 = vmul.f32 %v226_v19, %v226_v19  ;;  %511 = vlog2.f32 %v693_v20 }
  0xb9   :  { %v311_v49 = vsub.f32 1.5, %v310_v31  ;;  %v412_v63 = vsub.f32 %v394_v44, %v404_v43  ;;  %v317_v30 = vand.u32 2147483648, %v664_v55  ;;  %vm328_vm7 = vcmp.eq.f32.partialorder %v689_v15, 0.0 }
  0xba   :  { %v704_v29 = vmul.f32 %v698_v22, %v693_v20  ;;  %513 = vlog2.f32 %v698_v22  ;;  %v268_v32 = vadd.f32 %v258_v24, %v248_v23  ;;  %v504_v34 = vpop.eup %503  ;;  %v380_v9 = vadd.f32 %v379_v61, %v698_v22 }
  0xbb   :  { %v194_v27 = vpop.f32.mrf.mxu2  ;;  %v241_v33 = vpop.f32.mrf.mxu3  ;;  %v320_v40 = vmul.f32 %v504_v34, %v689_v15  ;;  %v312_v3 = vmul.f32 %v679_v6, %v311_v49  ;;  %v305_v6 = vand.u32 2147483648, %v655_v42  ;;  %v417_v24 = vand.u32 2147483647, %v412_v63 }
  0xbc   :  { %515 = vrsqrt.f32 %v704_v29  ;;  %v253_v36 = vmul.f32 %v194_v27, %v194_v27  ;;  %v506_v37 = vpop.eup %505  ;;  %v709_v45 = vmax.f32 %v268_v32, 1e-07  ;;  %v263_v46 = vmul.f32 %v241_v33, %v241_v33 }
  0xbd   :  { %v508_v41 = vpop.eup %507  ;;  %v321_v51 = vmul.f32 %v504_v34, %v320_v40  ;;  %v392_v56 = vmul.f32 0.6931472, %v506_v37  ;;  %v313_v23 = vmul.f32 %v312_v3, %v664_v55  ;;  %v306_v33 = vsel %vm304_vm2, %v305_v6, %v303_v21 }
  0xbe   :  { %v510_v47 = vpop.eup %509  ;;  %v273_v57 = vadd.f32 %v263_v46, %v253_v36  ;;  %517 = vlog2.f32 %v709_v45  ;;  %v406_v0 = vmul.f32 0.6931472, %v508_v41  ;;  %v329_v46 = vand.u32 2147483648, %v689_v15 }
  0xbf   :  { %v512_v53 = vpop.eup %511  ;;  %v322_v60 = vmul.f32 0.5, %v321_v51  ;;  %v396_v1 = vmul.f32 0.6931472, %v510_v47  ;;  %v411_v10 = vsub.f32 %v392_v56, %v402_v54  ;;  %v315_v40 = vsel %vm314_vm3, %v664_v55, %v313_v23  ;;  %v377_v55 = vld [vmem:[%s790_s3] sm:$0x1] }
  0xc0   :  { %v514_v58 = vpop.eup %513  ;;  %v717_v2 = vmax.f32 %v273_v57, 1e-07  ;;  %v408_v11 = vmul.f32 0.6931472, %v512_v53  ;;  %vm338_vm6 = vcmp.eq.f32.partialorder %v704_v29, inf  ;;  %v318_v54 = vsel %vm316_vm4, %v317_v30, %v315_v40 }
  0xc1   :  { %v323_v4 = vsub.f32 1.5, %v322_v60  ;;  %v398_v12 = vmul.f32 0.6931472, %v514_v58  ;;  %v413_v18 = vsub.f32 %v396_v1, %v406_v0  ;;  %v416_v26 = vand.u32 2147483647, %v411_v10 }
  0xc2   :  { %v516_v62 = vpop.eup %515  ;;  %v724_v13 = vmul.f32 %v717_v2, %v709_v45  ;;  %v381_v17 = vadd.f32 %v380_v9, %v717_v2  ;;  %519 = vlog2.f32 %v717_v2  ;;  %v341_v60 = vand.u32 2147483648, %v704_v29 }
  0xc3   :  { %v332_v7 = vmul.f32 %v516_v62, %v704_v29  ;;  %v324_v14 = vmul.f32 %v504_v34, %v323_v4  ;;  %v414_v27 = vsub.f32 %v398_v12, %v408_v11  ;;  %v418_v34 = vand.u32 2147483647, %v413_v18 }
  0xc4   :  { %521 = vrsqrt.f32 %v724_v13  ;;  %v518_v19 = vpop.eup %517  ;;  %v382_v28 = vrot.slane %v381_v17, 4  ;;  %v421_v41 = vadd.f32 %v417_v24, %v416_v26  ;;  %v356_v3 = vmul.f32 2.0, %v318_v54 }
  0xc5   :  { %v333_v16 = vmul.f32 %v516_v62, %v332_v7  ;;  %v325_v31 = vmul.f32 %v324_v14, %v689_v15  ;;  %v410_v36 = vmul.f32 0.6931472, %v518_v19  ;;  %v419_v47 = vand.u32 2147483647, %v414_v27 }
  0xc6   :  { %v383_v37 = vadd.f32 %v382_v28, %v381_v17  ;;  %v422_v56 = vadd.f32 %v421_v41, %v418_v34  ;;  %vm340_vm8 = vcmp.eq.f32.partialorder %v704_v29, 0.0  ;;  %v355_v10 = vmul.f32 2.0, %v306_v33 }
  0xc7   :  { %v334_v25 = vmul.f32 0.5, %v333_v16  ;;  %v327_v51 = vsel %vm326_vm5, %v689_v15, %v325_v31  ;;  %v286_v11 = vadd.f32 %v660_v52, %v658_v48  ;;  %v285_v16 = vadd.f32 %v651_v39, %v649_v35 }
  0xc8   :  { %v520_v38 = vpop.eup %519  ;;  %v384_v49 = vrot.slane %v383_v37, 2  ;;  %v423_v63 = vadd.f32 %v422_v56, %v419_v47  ;;  %v287_v18 = vadd.f32 %v681_v8, %v674_v5  ;;  %v288_v52 = vadd.f32 %v698_v22, %v693_v20 }
  0xc9   :  { %v335_v32 = vsub.f32 1.5, %v334_v25  ;;  %v400_v50 = vmul.f32 0.6931472, %v520_v38  ;;  %v360_v24 = vsub.f32 %v285_v16, %v355_v10  ;;  %vm350_vm9 = vcmp.eq.f32.partialorder %v724_v13, inf }
  0xca   :  { %v522_v44 = vpop.eup %521  ;;  %v385_v57 = vadd.f32 %v384_v49, %v383_v37  ;;  %v353_v39 = vand.u32 2147483648, %v724_v13  ;;  %vm352_vm10 = vcmp.eq.f32.partialorder %v724_v13, 0.0  ;;  %v289_v31 = vadd.f32 %v717_v2, %v709_v45  ;;  %v390_v37 = vld [vmem:[%s791_s4] sm:$0x1] }
  0xcb   :  { %v336_v43 = vmul.f32 %v516_v62, %v335_v32  ;;  %v344_v53 = vmul.f32 %v522_v44, %v724_v13  ;;  %v415_v58 = vsub.f32 %v400_v50, %v410_v36  ;;  %v330_v62 = vsel %vm328_vm7, %v329_v46, %v327_v51 }
  0xcc   :  { %v386_v0 = vrot.slane %v385_v57, 1  ;;  %v357_v12 = vmul.f32 2.0, %v330_v62 }
  0xcd   :  { %v337_v42 = vmul.f32 %v336_v43, %v704_v29  ;;  %v345_v61 = vmul.f32 %v522_v44, %v344_v53  ;;  %v420_v1 = vand.u32 2147483647, %v415_v58 }
  0xce   :  { %v387_v9 = vadd.f32 %v386_v0, %v385_v57  ;;  %v362_v48 = vsub.f32 %v287_v18, %v357_v12 }
  0xcf   :  { %v339_v59 = vsel %vm338_vm6, %v704_v29, %v337_v42  ;;  %v346_v4 = vmul.f32 0.5, %v345_v61  ;;  %v424_v15 = vadd.f32 %v423_v63, %v420_v1  ;;  %v361_v29 = vsub.f32 %v286_v11, %v356_v3 }
  0xd0   :  { %v342_v7 = vsel %vm340_vm8, %v341_v60, %v339_v59  ;;  %v388_v17 = vadd.f32 %v387_v9, %v377_v55 }
  0xd1   :  { %v347_v14 = vsub.f32 1.5, %v346_v4  ;;  %v425_v6 = vrot.slane %v424_v15, 4  ;;  %v358_v19 = vmul.f32 2.0, %v342_v7  ;;  %v365_v5 = vadd.f32 %v361_v29, %v360_v24 }
  0xd2   :  { %389 = vst [vmem:[%s790_s3] sm:$0x1] %v388_v17 }
  0xd3   :  { %v348_v21 = vmul.f32 %v522_v44, %v347_v14  ;;  %v426_v23 = vadd.f32 %v425_v6, %v424_v15  ;;  %v363_v8 = vsub.f32 %v288_v52, %v358_v19  ;;  %v366_v30 = vadd.f32 %v365_v5, %v362_v48  ;;  %v284_v44 = vld [vmem:[%s789_s2] sm:$0x1] }
  0xd5   :  { %v349_v35 = vmul.f32 %v348_v21, %v724_v13  ;;  %v427_v25 = vrot.slane %v426_v23, 2  ;;  %v367_v32 = vadd.f32 %v366_v30, %v363_v8 }
  0xd7   :  { %v351_v26 = vsel %vm350_vm9, %v724_v13, %v349_v35  ;;  %v428_v28 = vadd.f32 %v427_v25, %v426_v23 }
  0xd8   :  { %v354_v27 = vsel %vm352_vm10, %v353_v39, %v351_v26 }
  0xd9   :  { %v359_v20 = vmul.f32 2.0, %v354_v27  ;;  %v429_v22 = vrot.slane %v428_v28, 1 }
  0xdb   :  { %v364_v33 = vsub.f32 %v289_v31, %v359_v20  ;;  %v430_v34 = vadd.f32 %v429_v22, %v428_v28 }
  0xdd   :  { %v368_v36 = vadd.f32 %v367_v32, %v364_v33  ;;  %v431_v38 = vmul.f32 0.5, %v430_v34 }
  0xdf   :  { %v369_v40 = vrot.slane %v368_v36, 4  ;;  %v432_v41 = vadd.f32 %v431_v38, %v390_v37 }
  0xe1   :  { %v370_v13 = vadd.f32 %v369_v40, %v368_v36  ;;  %433 = vst [vmem:[%s791_s4] sm:$0x1] %v432_v41 }
  0xe3   :  { %v371_v43 = vrot.slane %v370_v13, 2 }
  0xe5   :  { %v372_v45 = vadd.f32 %v371_v43, %v370_v13 }
  0xe7   :  { %v373_v2 = vrot.slane %v372_v45, 1 }
  0xe9   :  { %v374_v46 = vadd.f32 %v373_v2, %v372_v45 }
  0xeb   :  { %v375_v47 = vadd.f32 %v374_v46, %v284_v44 }
  0xed   :  { %376 = vst [vmem:[%s789_s2] sm:$0x1] %v375_v47 }

// kernel: multi_resolution_stft_loss.4
= control target key start
LH: loop header
LB: loop body
LE: loop exit
PB: predicated region body
PF: predicated region fallthrough
CT: control target
= control target key end

     0   :  { %s599_s0 = inlined_call_operand.vmem [shape: f32[2,16,128], index: 0, kind: input, shape index: {}]   ;;  %s600_s1 = inlined_call_operand.vmem [shape: f32[128,256], index: 1, kind: input, shape index: {}]   ;;  %s601_s2 = inlined_call_operand.vmem [shape: f32[1,1,128], index: 2, kind: output, shape index: {0}]   ;;  %s602_s3 = inlined_call_operand.vmem [shape: f32[1,1,128], index: 3, kind: output, shape index: {1}]   ;;  %s603_s4 = inlined_call_operand.vmem [shape: f32[1,1,128], index: 4, kind: output, shape index: {2}]  }
   0x1   :  { %v408_v0 = vld [vmem:[%s600_s1] sm:$0xff]  ;;  %v413_v1 = vld [vmem:[%s600_s1 + $0x8] sm:$0xff]  ;;  %v418_v2 = vld [vmem:[%s600_s1 + $0x10] sm:$0xff] }
   0x2   :  { %v423_v3 = vld [vmem:[%s600_s1 + $0x18] sm:$0xff]  ;;  %v428_v4 = vld [vmem:[%s600_s1 + $0x20] sm:$0xff]  ;;  %v433_v5 = vld [vmem:[%s600_s1 + $0x28] sm:$0xff] }
   0x3   :  { %v438_v6 = vld [vmem:[%s600_s1 + $0x30] sm:$0xff]  ;;  %v443_v7 = vld [vmem:[%s600_s1 + $0x38] sm:$0xff]  ;;  %v448_v8 = vld [vmem:[%s600_s1 + $0x40] sm:$0xff] }
   0x4   :  { %v453_v9 = vld [vmem:[%s600_s1 + $0x48] sm:$0xff]  ;;  %v458_v10 = vld [vmem:[%s600_s1 + $0x50] sm:$0xff]  ;;  %v463_v11 = vld [vmem:[%s600_s1 + $0x58] sm:$0xff] }
   0x5   :  { %v72_v12 = vld [vmem:[%s600_s1 + $0x60] sm:$0xff]  ;;  %v74_v13 = vld [vmem:[%s600_s1 + $0x68] sm:$0xff]  ;;  %v76_v14 = vld [vmem:[%s600_s1 + $0x70] sm:$0xff] }
   0x6   :  { %v78_v15 = vld [vmem:[%s600_s1 + $0x78] sm:$0xff]  ;;  %v80_v16 = vld [vmem:[%s600_s1 + $0x80] sm:$0xff]  ;;  %v82_v17 = vld [vmem:[%s600_s1 + $0x88] sm:$0xff] }
   0x7   :  { %v84_v18 = vld [vmem:[%s600_s1 + $0x90] sm:$0xff]  ;;  %v86_v19 = vld [vmem:[%s600_s1 + $0x98] sm:$0xff]  ;;  %v88_v20 = vld [vmem:[%s600_s1 + $0xa0] sm:$0xff] }
   0x8   :  { %v90_v21 = vld [vmem:[%s600_s1 + $0xa8] sm:$0xff]  ;;  %v92_v22 = vld [vmem:[%s600_s1 + $0xb0] sm:$0xff]  ;;  %v94_v23 = vld [vmem:[%s600_s1 + $0xb8] sm:$0xff] }
   0x9   :  { %v96_v24 = vld [vmem:[%s600_s1 + $0xc0] sm:$0xff]  ;;  %v98_v25 = vld [vmem:[%s600_s1 + $0xc8] sm:$0xff]  ;;  %v100_v26 = vld [vmem:[%s600_s1 + $0xd0] sm:$0xff] }
   0xa   :  { %v102_v27 = vld [vmem:[%s600_s1 + $0xd8] sm:$0xff]  ;;  %v104_v28 = vld [vmem:[%s600_s1 + $0xe0] sm:$0xff]  ;;  %v106_v29 = vld [vmem:[%s600_s1 + $0xe8] sm:$0xff] }
   0xb   :  { %v108_v30 = vld [vmem:[%s600_s1 + $0xf0] sm:$0xff]  ;;  %v110_v31 = vld [vmem:[%s600_s1 + $0xf8] sm:$0xff] }
   0xc   :  { %117 = vsyncadd [#allocation3], 4096 }
   0xd   :  { %377 = dma.done.wait [#allocation3], 4096 }
   0xe   :  { %378 = vsyncadd [#allocation3], 4294963200  ;;  %332 = vmatpush.msra.mxu2 %v108_v30  ;;  %348 = vmatpush.msra.mxu3 %v110_v31  ;;  %v127_v32 = vld [vmem:[%s599_s0 + $0x10] sm:$0xff]  ;;  %v125_v33 = vld [vmem:[%s599_s0] sm:$0xff]  ;;  %v379_v36 = vmov 0.0  }
   0xf   :  { %161 = vmatpush.msra.mxu0 %v108_v30  ;;  %190 = vmatpush.msra.mxu1 %v110_v31  ;;  %v128_v34 = vld [vmem:[%s599_s0 + $0x18] sm:$0xff]  ;;  %v126_v35 = vld [vmem:[%s599_s0 + $0x8] sm:$0xff]  ;;  %122 = vst [vmem:[%s601_s2] sm:$0x1] %v379_v36 }
  0x10   :  { %333 = vmatpush.msra.mxu2 %v104_v28  ;;  %349 = vmatpush.msra.mxu3 %v106_v29  ;;  %123 = vst [vmem:[%s602_s3] sm:$0x1] %v379_v36 }
  0x11   :  { %162 = vmatpush.msra.mxu0 %v104_v28  ;;  %191 = vmatpush.msra.mxu1 %v106_v29  ;;  %124 = vst [vmem:[%s603_s4] sm:$0x1] %v379_v36 }
  0x12   :  { %334 = vmatpush.msra.mxu2 %v100_v26  ;;  %350 = vmatpush.msra.mxu3 %v102_v27 }
  0x13   :  { %163 = vmatpush.msra.mxu0 %v100_v26  ;;  %192 = vmatpush.msra.mxu1 %v102_v27 }
  0x14   :  { %335 = vmatpush.msra.mxu2 %v96_v24  ;;  %351 = vmatpush.msra.mxu3 %v98_v25 }
  0x15   :  { %164 = vmatpush.msra.mxu0 %v96_v24  ;;  %193 = vmatpush.msra.mxu1 %v98_v25 }
  0x16   :  { %336 = vmatpush.msra.mxu2 %v92_v22  ;;  %352 = vmatpush.msra.mxu3 %v94_v23 }
  0x17   :  { %165 = vmatpush.msra.mxu0 %v92_v22  ;;  %194 = vmatpush.msra.mxu1 %v94_v23  ;;  %v277_v26 = vld [vmem:[%s602_s3] sm:$0x1] }
  0x18   :  { %337 = vmatpush.msra.mxu2 %v88_v20  ;;  %353 = vmatpush.msra.mxu3 %v90_v21 }
  0x19   :  { %166 = vmatpush.msra.mxu0 %v88_v20  ;;  %195 = vmatpush.msra.mxu1 %v90_v21 }
  0x1a   :  { %338 = vmatpush.msra.mxu2 %v84_v18  ;;  %354 = vmatpush.msra.mxu3 %v86_v19 }
  0x1b   :  { %167 = vmatpush.msra.mxu0 %v84_v18  ;;  %196 = vmatpush.msra.mxu1 %v86_v19 }
  0x1c   :  { %339 = vmatpush.msra.mxu2 %v80_v16  ;;  %355 = vmatpush.msra.mxu3 %v82_v17 }
  0x1d   :  { %168 = vmatpush.msra.mxu0 %v80_v16  ;;  %197 = vmatpush.msra.mxu1 %v82_v17 }
  0x1e   :  { %340 = vmatpush.msra.mxu2 %v76_v14  ;;  %356 = vmatpush.msra.mxu3 %v78_v15 }
  0x1f   :  { %169 = vmatpush.msra.mxu0 %v76_v14  ;;  %198 = vmatpush.msra.mxu1 %v78_v15 }
  0x20   :  { %341 = vmatpush.msra.mxu2 %v72_v12  ;;  %357 = vmatpush.msra.mxu3 %v74_v13 }
  0x21   :  { %170 = vmatpush.msra.mxu0 %v72_v12  ;;  %199 = vmatpush.msra.mxu1 %v74_v13 }
  0x22   :  { %342 = vmatpush.msra.mxu2 %v458_v10  ;;  %358 = vmatpush.msra.mxu3 %v463_v11 }
  0x23   :  { %171 = vmatpush.msra.mxu0 %v458_v10  ;;  %200 = vmatpush.msra.mxu1 %v463_v11 }
  0x24   :  { %343 = vmatpush.msra.mxu2 %v448_v8  ;;  %359 = vmatpush.msra.mxu3 %v453_v9 }
  0x25   :  { %172 = vmatpush.msra.mxu0 %v448_v8  ;;  %201 = vmatpush.msra.mxu1 %v453_v9 }
  0x26   :  { %344 = vmatpush.msra.mxu2 %v438_v6  ;;  %360 = vmatpush.msra.mxu3 %v443_v7 }
  0x27   :  { %173 = vmatpush.msra.mxu0 %v438_v6  ;;  %202 = vmatpush.msra.mxu1 %v443_v7 }
  0x28   :  { %345 = vmatpush.msra.mxu2 %v428_v4  ;;  %361 = vmatpush.msra.mxu3 %v433_v5 }
  0x29   :  { %174 = vmatpush.msra.mxu0 %v428_v4  ;;  %203 = vmatpush.msra.mxu1 %v433_v5 }
  0x2a   :  { %346 = vmatpush.msra.mxu2 %v418_v2  ;;  %362 = vmatpush.msra.mxu3 %v423_v3 }
  0x2b   :  { %175 = vmatpush.msra.mxu0 %v418_v2  ;;  %204 = vmatpush.msra.mxu1 %v423_v3 }
  0x2c   :  { %347 = vmatpush.msra.mxu2 %v408_v0  ;;  %363 = vmatpush.msra.mxu3 %v413_v1 }
  0x2d   :  { %183 = vmatmul.f32.vlgmr.msra.gmra.mxu2 %v127_v32  ;;  %212 = vmatmul.f32.vlgmr.msra.gmra.mxu3 %v127_v32 }
  0x2e   :  { %176 = vmatpush.msra.mxu0 %v408_v0  ;;  %205 = vmatpush.msra.mxu1 %v413_v1 }
  0x2f   :  { %177 = vmatmul.f32.vlgmr.msra.gmra.mxu0 %v125_v33  ;;  %206 = vmatmul.f32.vlgmr.msra.gmra.mxu1 %v125_v33 }
  0x35   :  { %186 = vmatmul.f32.gmra.mxu2 %v128_v34  ;;  %215 = vmatmul.f32.gmra.mxu3 %v128_v34 }
  0x37   :  { %180 = vmatmul.f32.gmra.mxu0 %v126_v35  ;;  %209 = vmatmul.f32.gmra.mxu1 %v126_v35 }
  0xac   :  { %v178_v37 = vpop.f32.mrf.mxu0  ;;  %v207_v38 = vpop.f32.mrf.mxu1 }
  0xad   :  { %v219_v39 = vmul.f32 %v178_v37, %v178_v37  ;;  %v223_v40 = vmul.f32 %v207_v38, %v207_v38 }
  0xaf   :  { %v227_v41 = vadd.f32 %v223_v40, %v219_v39 }
  0xb0   :  { %v184_v42 = vpop.f32.mrf.mxu2  ;;  %v213_v43 = vpop.f32.mrf.mxu3 }
  0xb1   :  { %v221_v44 = vmul.f32 %v184_v42, %v184_v42  ;;  %v225_v45 = vmul.f32 %v213_v43, %v213_v43  ;;  %v570_v46 = vmax.f32 %v227_v41, 1e-07 }
  0xb3   :  { %v229_v47 = vadd.f32 %v225_v45, %v221_v44 }
  0xb4   :  { %v181_v48 = vpop.f32.mrf.mxu0  ;;  %v210_v49 = vpop.f32.mrf.mxu1 }
  0xb5   :  { %v572_v50 = vmax.f32 %v229_v47, 1e-07  ;;  %v220_v51 = vmul.f32 %v181_v48, %v181_v48  ;;  %v224_v52 = vmul.f32 %v210_v49, %v210_v49 }
  0xb7   :  { %v238_v53 = vmul.f32 %v572_v50, %v570_v46  ;;  %v228_v54 = vadd.f32 %v224_v52, %v220_v51  ;;  %v236_v47 = vadd.f32 %v572_v50, %v570_v46 }
  0xb8   :  { %v187_v55 = vpop.f32.mrf.mxu2  ;;  %v216_v56 = vpop.f32.mrf.mxu3 }
  0xb9   :  { %365 = vrsqrt.f32 %v238_v53  ;;  %v222_v57 = vmul.f32 %v187_v55, %v187_v55  ;;  %v232_v58 = vmax.f32 %v228_v54, 1e-07  ;;  %v226_v59 = vmul.f32 %v216_v56, %v216_v56  ;;  %v287_v56 = vld [vmem:[%s603_s4] sm:$0x1] }
  0xba   :  { %367 = vlog2.f32 %v570_v46  ;;  %vm247_vm0 = vcmp.eq.f32.partialorder %v238_v53, inf  ;;  %v250_v34 = vand.u32 2147483648, %v238_v53  ;;  %vm249_vm1 = vcmp.eq.f32.partialorder %v238_v53, 0.0 }
  0xbb   :  { %369 = vlog2.f32 %v572_v50  ;;  %v230_v60 = vadd.f32 %v226_v59, %v222_v57 }
  0xbc   :  { %371 = vlog2.f32 %v232_v58 }
  0xbd   :  { %v234_v61 = vmax.f32 %v230_v60, 1e-07 }
  0xbf   :  { %v366_v62 = vpop.eup %365  ;;  %v239_v1 = vmul.f32 %v234_v61, %v232_v58  ;;  %v278_v3 = vadd.f32 %v234_v61, %v572_v50  ;;  %373 = vlog2.f32 %v234_v61  ;;  %v237_v48 = vadd.f32 %v234_v61, %v232_v58  ;;  %v235_v61 = vld [vmem:[%s601_s2] sm:$0x1] }
  0xc0   :  { %v368_v63 = vpop.eup %367  ;;  %v241_v0 = vmul.f32 %v366_v62, %v238_v53 }
  0xc1   :  { %v370_v2 = vpop.eup %369  ;;  %375 = vrsqrt.f32 %v239_v1  ;;  %v279_v6 = vrot.slane %v278_v3, 4  ;;  %v293_v7 = vmul.f32 0.6931472, %v368_v63  ;;  %vm259_vm2 = vcmp.eq.f32.partialorder %v239_v1, inf }
  0xc2   :  { %v242_v4 = vmul.f32 %v366_v62, %v241_v0  ;;  %v372_v5 = vpop.eup %371  ;;  %v289_v9 = vmul.f32 0.6931472, %v370_v2  ;;  %v262_v40 = vand.u32 2147483648, %v239_v1  ;;  %vm261_vm3 = vcmp.eq.f32.partialorder %v239_v1, 0.0 }
  0xc3   :  { %v280_v10 = vadd.f32 %v279_v6, %v278_v3  ;;  %v295_v12 = vmul.f32 0.6931472, %v372_v5 }
  0xc4   :  { %v243_v8 = vmul.f32 0.5, %v242_v4  ;;  %v296_v17 = vsub.f32 %v289_v9, %v293_v7 }
  0xc5   :  { %v374_v13 = vpop.eup %373  ;;  %v281_v14 = vrot.slane %v280_v10, 2 }
  0xc6   :  { %v244_v11 = vsub.f32 1.5, %v243_v8  ;;  %v291_v18 = vmul.f32 0.6931472, %v374_v13  ;;  %v298_v25 = vand.u32 2147483647, %v296_v17 }
  0xc7   :  { %v376_v15 = vpop.eup %375  ;;  %v282_v20 = vadd.f32 %v281_v14, %v280_v10 }
  0xc8   :  { %v245_v16 = vmul.f32 %v366_v62, %v244_v11  ;;  %v253_v19 = vmul.f32 %v376_v15, %v239_v1  ;;  %v297_v21 = vsub.f32 %v291_v18, %v295_v12 }
  0xc9   :  { %v283_v24 = vrot.slane %v282_v20, 1 }
  0xca   :  { %v246_v22 = vmul.f32 %v245_v16, %v238_v53  ;;  %v254_v23 = vmul.f32 %v376_v15, %v253_v19  ;;  %v299_v27 = vand.u32 2147483647, %v297_v21 }
  0xcb   :  { %v284_v29 = vadd.f32 %v283_v24, %v282_v20 }
  0xcc   :  { %v255_v28 = vmul.f32 0.5, %v254_v23  ;;  %v300_v30 = vadd.f32 %v299_v27, %v298_v25  ;;  %v248_v31 = vsel %vm247_vm0, %v238_v53, %v246_v22 }
  0xcd   :  { %v285_v33 = vadd.f32 %v284_v29, %v277_v26  ;;  %v251_v37 = vsel %vm249_vm1, %v250_v34, %v248_v31 }
  0xce   :  { %v256_v32 = vsub.f32 1.5, %v255_v28  ;;  %v301_v35 = vrot.slane %v300_v30, 4  ;;  %v264_v42 = vmul.f32 2.0, %v251_v37 }
  0xcf   :  { %286 = vst [vmem:[%s602_s3] sm:$0x1] %v285_v33 }
  0xd0   :  { %v257_v36 = vmul.f32 %v376_v15, %v256_v32  ;;  %v302_v38 = vadd.f32 %v301_v35, %v300_v30  ;;  %v266_v52 = vsub.f32 %v236_v47, %v264_v42 }
  0xd2   :  { %v258_v39 = vmul.f32 %v257_v36, %v239_v1  ;;  %v303_v41 = vrot.slane %v302_v38, 2 }
  0xd4   :  { %v260_v43 = vsel %vm259_vm2, %v239_v1, %v258_v39  ;;  %v304_v45 = vadd.f32 %v303_v41, %v302_v38 }
  0xd5   :  { %v263_v44 = vsel %vm261_vm3, %v262_v40, %v260_v43 }
  0xd6   :  { %v265_v49 = vmul.f32 2.0, %v263_v44  ;;  %v305_v51 = vrot.slane %v304_v45, 1 }
  0xd8   :  { %v267_v53 = vsub.f32 %v237_v48, %v265_v49  ;;  %v306_v54 = vadd.f32 %v305_v51, %v304_v45 }
  0xda   :  { %v268_v55 = vadd.f32 %v267_v53, %v266_v52  ;;  %v307_v57 = vmul.f32 0.5, %v306_v54 }
  0xdc   :  { %v269_v59 = vrot.slane %v268_v55, 4  ;;  %v308_v60 = vadd.f32 %v307_v57, %v287_v56 }
  0xde   :  { %v270_v62 = vadd.f32 %v269_v59, %v268_v55  ;;  %309 = vst [vmem:[%s603_s4] sm:$0x1] %v308_v60 }
  0xe0   :  { %v271_v46 = vrot.slane %v270_v62, 2 }
  0xe2   :  { %v272_v50 = vadd.f32 %v271_v46, %v270_v62 }
  0xe4   :  { %v273_v58 = vrot.slane %v272_v50, 1 }
  0xe6   :  { %v274_v63 = vadd.f32 %v273_v58, %v272_v50 }
  0xe8   :  { %v275_v0 = vadd.f32 %v274_v63, %v235_v61 }
  0xea   :  { %276 = vst [vmem:[%s601_s2] sm:$0x1] %v275_v0 }

// kernel: multi_resolution_stft_loss.5
= control target key start
LH: loop header
LB: loop body
LE: loop exit
PB: predicated region body
PF: predicated region fallthrough
CT: control target
= control target key end

     0   :  { %s1163_s0 = inlined_call_operand.vmem [shape: f32[2,72,32], index: 0, kind: input, shape index: {}]   ;;  %s1164_s1 = inlined_call_operand.vmem [shape: f32[32,256], index: 1, kind: input, shape index: {}]   ;;  %s1165_s2 = inlined_call_operand.vmem [shape: f32[1,1,128], index: 2, kind: output, shape index: {0}]   ;;  %s1166_s3 = inlined_call_operand.vmem [shape: f32[1,1,128], index: 3, kind: output, shape index: {1}]   ;;  %s1167_s4 = inlined_call_operand.vmem [shape: f32[1,1,128], index: 4, kind: output, shape index: {2}]  }
   0x1   :  { %v48_v0 = vld [vmem:[%s1164_s1] sm:$0xff]  ;;  %v50_v1 = vld [vmem:[%s1164_s1 + $0x8] sm:$0xff]  ;;  %v52_v2 = vld [vmem:[%s1164_s1 + $0x10] sm:$0xff] }
   0x2   :  { %v54_v3 = vld [vmem:[%s1164_s1 + $0x18] sm:$0xff]  ;;  %v56_v4 = vld [vmem:[%s1164_s1 + $0x20] sm:$0xff]  ;;  %v58_v5 = vld [vmem:[%s1164_s1 + $0x28] sm:$0xff] }
   0x3   :  { %v60_v6 = vld [vmem:[%s1164_s1 + $0x30] sm:$0xff]  ;;  %v62_v7 = vld [vmem:[%s1164_s1 + $0x38] sm:$0xff] }
   0x4   :  { %69 = vsyncadd [#allocation3], 1024 }
   0x5   :  { %743 = dma.done.wait [#allocation3], 1024 }
   0x6   :  { %744 = vsyncadd [#allocation3], 4294966272  ;;  %680 = vmatpush.msra.mxu2 %v60_v6  ;;  %684 = vmatpush.msra.mxu3 %v62_v7  ;;  %v86_v8 = vld [vmem:[%s1163_s0 + $0x48] sm:$0xff]  ;;  %vm103_vm0 = vcmask 261120   ;;  %v77_v9 = vld [vmem:[%s1163_s0] sm:$0xff] }
   0x7   :  { %170 = vmatpush.msra.mxu0 %v60_v6  ;;  %241 = vmatpush.msra.mxu1 %v62_v7  ;;  %v87_v10 = vld [vmem:[%s1163_s0 + $0x50] sm:$0xff]  ;;  %v78_v11 = vld [vmem:[%s1163_s0 + $0x8] sm:$0xff]  ;;  %v88_v12 = vld [vmem:[%s1163_s0 + $0x58] sm:$0xff] }
   0x8   :  { %681 = vmatpush.msra.mxu2 %v56_v4  ;;  %685 = vmatpush.msra.mxu3 %v58_v5  ;;  %v79_v13 = vld [vmem:[%s1163_s0 + $0x10] sm:$0xff]  ;;  %v89_v14 = vld [vmem:[%s1163_s0 + $0x60] sm:$0xff]  ;;  %v80_v15 = vld [vmem:[%s1163_s0 + $0x18] sm:$0xff] }
   0x9   :  { %171 = vmatpush.msra.mxu0 %v56_v4  ;;  %242 = vmatpush.msra.mxu1 %v58_v5  ;;  %v90_v16 = vld [vmem:[%s1163_s0 + $0x68] sm:$0xff]  ;;  %v81_v17 = vld [vmem:[%s1163_s0 + $0x20] sm:$0xff]  ;;  %v91_v18 = vld [vmem:[%s1163_s0 + $0x70] sm:$0xff] }
   0xa   :  { %682 = vmatpush.msra.mxu2 %v52_v2  ;;  %686 = vmatpush.msra.mxu3 %v54_v3  ;;  %v82_v19 = vld [vmem:[%s1163_s0 + $0x28] sm:$0xff]  ;;  %v92_v20 = vld [vmem:[%s1163_s0 + $0x78] sm:$0xff]  ;;  %v83_v21 = vld [vmem:[%s1163_s0 + $0x30] sm:$0xff] }
   0xb   :  { %172 = vmatpush.msra.mxu0 %v52_v2  ;;  %243 = vmatpush.msra.mxu1 %v54_v3  ;;  %v93_v22 = vld [vmem:[%s1163_s0 + $0x80] sm:$0xff]  ;;  %v84_v23 = vld [vmem:[%s1163_s0 + $0x38] sm:$0xff]  ;;  %v94_v24 = vld [vmem:[%s1163_s0 + $0x88] sm:$0xff] }
   0xc   :  { %683 = vmatpush.msra.mxu2 %v48_v0  ;;  %687 = vmatpush.msra.mxu3 %v50_v1  ;;  %v85_v25 = vld [vmem:[%s1163_s0 + $0x40] sm:$0xff] }
   0xd   :  { %653 = vmatmul.msk.f32.vlgmr.msra.gmra.mxu2 %vm103_vm0, %v86_v8  ;;  %671 = vmatmul.msk.f32.vlgmr.msra.gmra.mxu3 %vm103_vm0, %v86_v8 }
   0xe   :  { %173 = vmatpush.msra.mxu0 %v48_v0  ;;  %244 = vmatpush.msra.mxu1 %v50_v1 }
   0xf   :  { %644 = vmatmul.msk.f32.vlgmr.msra.gmra.mxu0 %vm103_vm0, %v77_v9  ;;  %662 = vmatmul.msk.f32.vlgmr.msra.gmra.mxu1 %vm103_vm0, %v77_v9 }
  0x15   :  { %654 = vmatmul.msk.f32.gmra.mxu2 %vm103_vm0, %v87_v10  ;;  %672 = vmatmul.msk.f32.gmra.mxu3 %vm103_vm0, %v87_v10 }
  0x17   :  { %645 = vmatmul.msk.f32.gmra.mxu0 %vm103_vm0, %v78_v11  ;;  %663 = vmatmul.msk.f32.gmra.mxu1 %vm103_vm0, %v78_v11 }
  0x1d   :  { %655 = vmatmul.msk.f32.gmra.mxu2 %vm103_vm0, %v88_v12  ;;  %673 = vmatmul.msk.f32.gmra.mxu3 %vm103_vm0, %v88_v12 }
  0x1f   :  { %646 = vmatmul.msk.f32.gmra.mxu0 %vm103_vm0, %v79_v13  ;;  %664 = vmatmul.msk.f32.gmra.mxu1 %vm103_vm0, %v79_v13 }
  0x25   :  { %656 = vmatmul.msk.f32.gmra.mxu2 %vm103_vm0, %v89_v14  ;;  %674 = vmatmul.msk.f32.gmra.mxu3 %vm103_vm0, %v89_v14 }
  0x27   :  { %647 = vmatmul.msk.f32.gmra.mxu0 %vm103_vm0, %v80_v15  ;;  %665 = vmatmul.msk.f32.gmra.mxu1 %vm103_vm0, %v80_v15 }
  0x2d   :  { %657 = vmatmul.msk.f32.gmra.mxu2 %vm103_vm0, %v90_v16  ;;  %675 = vmatmul.msk.f32.gmra.mxu3 %vm103_vm0, %v90_v16 }
  0x2f   :  { %648 = vmatmul.msk.f32.gmra.mxu0 %vm103_vm0, %v81_v17  ;;  %666 = vmatmul.msk.f32.gmra.mxu1 %vm103_vm0, %v81_v17 }
  0x35   :  { %658 = vmatmul.msk.f32.gmra.mxu2 %vm103_vm0, %v91_v18  ;;  %676 = vmatmul.msk.f32.gmra.mxu3 %vm103_vm0, %v91_v18 }
  0x37   :  { %649 = vmatmul.msk.f32.gmra.mxu0 %vm103_vm0, %v82_v19  ;;  %667 = vmatmul.msk.f32.gmra.mxu1 %vm103_vm0, %v82_v19 }
  0x3d   :  { %659 = vmatmul.msk.f32.gmra.mxu2 %vm103_vm0, %v92_v20  ;;  %677 = vmatmul.msk.f32.gmra.mxu3 %vm103_vm0, %v92_v20 }
  0x3f   :  { %650 = vmatmul.msk.f32.gmra.mxu0 %vm103_vm0, %v83_v21  ;;  %668 = vmatmul.msk.f32.gmra.mxu1 %vm103_vm0, %v83_v21 }
  0x45   :  { %660 = vmatmul.msk.f32.gmra.mxu2 %vm103_vm0, %v93_v22  ;;  %678 = vmatmul.msk.f32.gmra.mxu3 %vm103_vm0, %v93_v22 }
  0x47   :  { %651 = vmatmul.msk.f32.gmra.mxu0 %vm103_vm0, %v84_v23  ;;  %669 = vmatmul.msk.f32.gmra.mxu1 %vm103_vm0, %v84_v23 }
  0x4d   :  { %661 = vmatmul.msk.f32.gmra.mxu2 %vm103_vm0, %v94_v24  ;;  %679 = vmatmul.msk.f32.gmra.mxu3 %vm103_vm0, %v94_v24 }
  0x4f   :  { %652 = vmatmul.msk.f32.gmra.mxu0 %vm103_vm0, %v85_v25  ;;  %670 = vmatmul.msk.f32.gmra.mxu1 %vm103_vm0, %v85_v25 }
  0x8c   :  { %v175_v26 = vpop.f32.mrf.mxu0  ;;  %v246_v27 = vpop.f32.mrf.mxu1 }
  0x8d   :  { %v300_v28 = vmul.f32 %v175_v26, %v175_v26  ;;  %v318_v29 = vmul.f32 %v246_v27, %v246_v27 }
  0x8f   :  { %v336_v30 = vadd.f32 %v318_v29, %v300_v28 }
  0x90   :  { %v202_v31 = vpop.f32.mrf.mxu2  ;;  %v273_v32 = vpop.f32.mrf.mxu3 }
  0x91   :  { %v309_v33 = vmul.f32 %v202_v31, %v202_v31  ;;  %v327_v34 = vmul.f32 %v273_v32, %v273_v32  ;;  %v885_v35 = vmax.f32 %v336_v30, 1e-07 }
  0x93   :  { %v345_v36 = vadd.f32 %v327_v34, %v309_v33 }
  0x94   :  { %v178_v37 = vpop.f32.mrf.mxu0  ;;  %v249_v38 = vpop.f32.mrf.mxu1 }
  0x95   :  { %v887_v39 = vmax.f32 %v345_v36, 1e-07  ;;  %v301_v40 = vmul.f32 %v178_v37, %v178_v37  ;;  %v319_v41 = vmul.f32 %v249_v38, %v249_v38 }
  0x97   :  { %v891_v42 = vmul.f32 %v887_v39, %v885_v35  ;;  %v337_v44 = vadd.f32 %v319_v41, %v301_v40 }
  0x98   :  { %v205_v43 = vpop.f32.mrf.mxu2  ;;  %v276_v45 = vpop.f32.mrf.mxu3 }
  0x99   :  { %v310_v46 = vmul.f32 %v205_v43, %v205_v43  ;;  %v328_v47 = vmul.f32 %v276_v45, %v276_v45  ;;  %689 = vrsqrt.f32 %v891_v42  ;;  %v894_v48 = vmax.f32 %v337_v44, 1e-07 }
  0x9a   :  { %vm398_vm1 = vcmp.eq.f32.partialorder %v891_v42, inf  ;;  %vm400_vm2 = vcmp.eq.f32.partialorder %v891_v42, 0.0 }
  0x9b   :  { %v346_v49 = vadd.f32 %v328_v47, %v310_v46 }
  0x9c   :  { %v181_v50 = vpop.f32.mrf.mxu0  ;;  %v252_v51 = vpop.f32.mrf.mxu1 }
  0x9d   :  { %v896_v52 = vmax.f32 %v346_v49, 1e-07  ;;  %v302_v53 = vmul.f32 %v181_v50, %v181_v50  ;;  %v320_v54 = vmul.f32 %v252_v51, %v252_v51 }
  0x9f   :  { %v900_v55 = vmul.f32 %v896_v52, %v894_v48  ;;  %v690_v58 = vpop.eup %689  ;;  %v338_v60 = vadd.f32 %v320_v54, %v302_v53 }
  0xa0   :  { %v208_v56 = vpop.f32.mrf.mxu2  ;;  %v279_v57 = vpop.f32.mrf.mxu3  ;;  %v392_v61 = vmul.f32 %v690_v58, %v891_v42 }
  0xa1   :  { %691 = vrsqrt.f32 %v900_v55  ;;  %v311_v59 = vmul.f32 %v208_v56, %v208_v56  ;;  %v329_v62 = vmul.f32 %v279_v57, %v279_v57  ;;  %v904_v4 = vmax.f32 %v338_v60, 1e-07 }
  0xa2   :  { %v393_v6 = vmul.f32 %v690_v58, %v392_v61  ;;  %693 = vlog2.f32 %v885_v35  ;;  %v938_v57 = vadd.f32 %v887_v39, %v885_v35  ;;  %vm410_vm3 = vcmp.eq.f32.partialorder %v900_v55, inf }
  0xa3   :  { %v347_v3 = vadd.f32 %v329_v62, %v311_v59  ;;  %695 = vlog2.f32 %v887_v39  ;;  %vm412_vm4 = vcmp.eq.f32.partialorder %v900_v55, 0.0 }
  0xa4   :  { %v184_v63 = vpop.f32.mrf.mxu0  ;;  %v255_v0 = vpop.f32.mrf.mxu1  ;;  %v394_v15 = vmul.f32 0.5, %v393_v6 }
  0xa5   :  { %v303_v1 = vmul.f32 %v184_v63, %v184_v63  ;;  %v321_v2 = vmul.f32 %v255_v0, %v255_v0  ;;  %v906_v7 = vmax.f32 %v347_v3, 1e-07 }
  0xa6   :  { %v395_v22 = vsub.f32 1.5, %v394_v15  ;;  %v534_v15 = vadd.f32 %v896_v52, %v887_v39 }
  0xa7   :  { %v692_v5 = vpop.eup %691  ;;  %v339_v12 = vadd.f32 %v321_v2, %v303_v1  ;;  %v911_v14 = vmul.f32 %v906_v7, %v904_v4 }
  0xa8   :  { %v211_v8 = vpop.f32.mrf.mxu2  ;;  %v282_v9 = vpop.f32.mrf.mxu3  ;;  %v404_v10 = vmul.f32 %v692_v5, %v900_v55  ;;  %v396_v32 = vmul.f32 %v690_v58, %v395_v22 }
  0xa9   :  { %v312_v11 = vmul.f32 %v211_v8, %v211_v8  ;;  %v330_v13 = vmul.f32 %v282_v9, %v282_v9  ;;  %v914_v20 = vmax.f32 %v339_v12, 1e-07  ;;  %697 = vrsqrt.f32 %v911_v14  ;;  %v694_v29 = vpop.eup %693 }
  0xaa   :  { %v405_v16 = vmul.f32 %v692_v5, %v404_v10  ;;  %699 = vlog2.f32 %v894_v48  ;;  %v696_v31 = vpop.eup %695  ;;  %v570_v47 = vmul.f32 0.6931472, %v694_v29  ;;  %v397_v49 = vmul.f32 %v396_v32, %v891_v42 }
  0xab   :  { %v348_v17 = vadd.f32 %v330_v13, %v312_v11  ;;  %701 = vlog2.f32 %v896_v52  ;;  %v552_v58 = vmul.f32 0.6931472, %v696_v31  ;;  %v954_v13 = vadd.f32 %v896_v52, %v894_v48 }
  0xac   :  { %v187_v18 = vpop.f32.mrf.mxu0  ;;  %v258_v19 = vpop.f32.mrf.mxu1  ;;  %v406_v23 = vmul.f32 0.5, %v405_v16  ;;  %v399_v35 = vsel %vm398_vm1, %v891_v42, %v397_v49  ;;  %v413_v32 = vand.u32 2147483648, %v900_v55  ;;  %vm422_vm5 = vcmp.eq.f32.partialorder %v911_v14, inf }
  0xad   :  { %v918_v21 = vmax.f32 %v348_v17, 1e-07  ;;  %v304_v27 = vmul.f32 %v187_v18, %v187_v18  ;;  %v322_v28 = vmul.f32 %v258_v19, %v258_v19  ;;  %v587_v12 = vsub.f32 %v552_v58, %v570_v47 }
  0xae   :  { %v407_v33 = vsub.f32 1.5, %v406_v23  ;;  %v535_v47 = vadd.f32 %v534_v15, %v906_v7  ;;  %vm424_vm6 = vcmp.eq.f32.partialorder %v911_v14, 0.0 }
  0xaf   :  { %v924_v26 = vmul.f32 %v918_v21, %v914_v20  ;;  %v927_v37 = vpop.eup %697  ;;  %v340_v38 = vadd.f32 %v322_v28, %v304_v27  ;;  %v596_v31 = vand.u32 2147483647, %v587_v12 }
  0xb0   :  { %v214_v24 = vpop.f32.mrf.mxu2  ;;  %v285_v25 = vpop.f32.mrf.mxu3  ;;  %v408_v50 = vmul.f32 %v692_v5, %v407_v33  ;;  %v416_v51 = vmul.f32 %v927_v37, %v911_v14  ;;  %v401_v5 = vand.u32 2147483648, %v891_v42 }
  0xb1   :  { %703 = vrsqrt.f32 %v924_v26  ;;  %v313_v30 = vmul.f32 %v214_v24, %v214_v24  ;;  %v331_v40 = vmul.f32 %v285_v25, %v285_v25  ;;  %v700_v41 = vpop.eup %699  ;;  %v940_v59 = vmax.f32 %v340_v38, 1e-07 }
  0xb2   :  { %705 = vlog2.f32 %v904_v4  ;;  %v702_v43 = vpop.eup %701  ;;  %v572_v61 = vmul.f32 0.6931472, %v700_v41  ;;  %v409_v6 = vmul.f32 %v408_v50, %v900_v55  ;;  %v417_v8 = vmul.f32 %v927_v37, %v416_v51 }
  0xb3   :  { %707 = vlog2.f32 %v906_v7  ;;  %v349_v44 = vadd.f32 %v331_v40, %v313_v30  ;;  %v554_v62 = vmul.f32 0.6931472, %v702_v43  ;;  %v402_v19 = vsel %vm400_vm2, %v401_v5, %v399_v35 }
  0xb4   :  { %v190_v34 = vpop.f32.mrf.mxu0  ;;  %v261_v36 = vpop.f32.mrf.mxu1  ;;  %709 = vlog2.f32 %v914_v20  ;;  %v411_v39 = vsel %vm410_vm3, %v900_v55, %v409_v6  ;;  %v418_v52 = vmul.f32 0.5, %v417_v8  ;;  %v974_v30 = vmul.f32 2.0, %v402_v19 }
  0xb5   :  { %v305_v45 = vmul.f32 %v190_v34, %v190_v34  ;;  %v323_v46 = vmul.f32 %v261_v36, %v261_v36  ;;  %v942_v60 = vmax.f32 %v349_v44, 1e-07  ;;  %v588_v17 = vsub.f32 %v554_v62, %v572_v61 }
  0xb6   :  { %711 = vlog2.f32 %v918_v21  ;;  %v980_v34 = vadd.f32 %v906_v7, %v904_v4  ;;  %v414_v41 = vsel %vm412_vm4, %v413_v32, %v411_v39  ;;  %v508_v4 = vsub.f32 %v938_v57, %v974_v30 }
  0xb7   :  { %v934_v56 = vpop.eup %703  ;;  %v341_v2 = vadd.f32 %v323_v46, %v305_v45  ;;  %v960_v16 = vmul.f32 %v942_v60, %v940_v59  ;;  %v597_v33 = vand.u32 2147483647, %v588_v17  ;;  %v419_v46 = vsub.f32 1.5, %v418_v52 }
  0xb8   :  { %v217_v53 = vpop.f32.mrf.mxu2  ;;  %v288_v54 = vpop.f32.mrf.mxu3  ;;  %v428_v0 = vmul.f32 %v934_v56, %v924_v26  ;;  %v500_v61 = vmul.f32 2.0, %v414_v41  ;;  %v996_v7 = vadd.f32 %v918_v21, %v914_v20  ;;  %vm434_vm7 = vcmp.eq.f32.partialorder %v924_v26, inf }
  0xb9   :  { %v706_v63 = vpop.eup %705  ;;  %v314_v1 = vmul.f32 %v217_v53, %v217_v53  ;;  %v332_v3 = vmul.f32 %v288_v54, %v288_v54  ;;  %v967_v48 = vmax.f32 %v341_v2, 1e-07  ;;  %713 = vrsqrt.f32 %v960_v16 }
  0xba   :  { %v708_v11 = vpop.eup %707  ;;  %v574_v18 = vmul.f32 0.6931472, %v706_v63  ;;  %v429_v22 = vmul.f32 %v934_v56, %v428_v0  ;;  %v605_v51 = vadd.f32 %v597_v33, %v596_v31  ;;  %v425_v53 = vand.u32 2147483648, %v911_v14 }
  0xbb   :  { %v350_v23 = vadd.f32 %v332_v3, %v314_v1  ;;  %v556_v24 = vmul.f32 0.6931472, %v708_v11  ;;  %v710_v40 = vpop.eup %709  ;;  %v420_v35 = vmul.f32 %v927_v37, %v419_v46  ;;  %v509_v15 = vsub.f32 %v954_v13, %v500_v61 }
  0xbc   :  { %v193_v9 = vpop.f32.mrf.mxu0  ;;  %v264_v10 = vpop.f32.mrf.mxu1  ;;  %v430_v36 = vmul.f32 0.5, %v429_v22  ;;  %v576_v0 = vmul.f32 0.6931472, %v710_v40  ;;  %v536_v19 = vadd.f32 %v535_v47, %v918_v21  ;;  %vm436_vm8 = vcmp.eq.f32.partialorder %v924_v26, 0.0 }
  0xbd   :  { %v972_v28 = vmax.f32 %v350_v23, 1e-07  ;;  %v306_v29 = vmul.f32 %v193_v9, %v193_v9  ;;  %v324_v42 = vmul.f32 %v264_v10, %v264_v10  ;;  %v589_v43 = vsub.f32 %v556_v24, %v574_v18  ;;  %v712_v50 = vpop.eup %711 }
  0xbe   :  { %v431_v62 = vsub.f32 1.5, %v430_v36  ;;  %v558_v5 = vmul.f32 0.6931472, %v712_v50  ;;  %v745_v23 = vmov 0.0   ;;  %v421_v52 = vmul.f32 %v420_v35, %v911_v14 }
  0xbf   :  { %v984_v38 = vmul.f32 %v972_v28, %v967_v48  ;;  %v342_v55 = vadd.f32 %v324_v42, %v306_v29  ;;  %v992_v58 = vpop.eup %713  ;;  %v598_v63 = vand.u32 2147483647, %v589_v43  ;;  %74 = vst [vmem:[%s1165_s2] sm:$0x1] %v745_v23  ;;  %v1035_v29 = vadd.f32 %v509_v15, %v508_v4 }
  0xc0   :  { %v220_v25 = vpop.f32.mrf.mxu2  ;;  %v291_v27 = vpop.f32.mrf.mxu3  ;;  %v440_v20 = vmul.f32 %v992_v58, %v960_v16  ;;  %v432_v17 = vmul.f32 %v934_v56, %v431_v62  ;;  %v437_v56 = vand.u32 2147483648, %v924_v26  ;;  %v590_v39 = vsub.f32 %v558_v5, %v576_v0  ;;  %75 = vst [vmem:[%s1166_s3] sm:$0x1] %v745_v23 }
  0xc1   :  { %v315_v44 = vmul.f32 %v220_v25, %v220_v25  ;;  %v333_v45 = vmul.f32 %v291_v27, %v291_v27  ;;  %715 = vrsqrt.f32 %v984_v38  ;;  %v1001_v6 = vmax.f32 %v342_v55, 1e-07  ;;  %76 = vst [vmem:[%s1167_s4] sm:$0x1] %v745_v23 }
  0xc2   :  { %717 = vlog2.f32 %v940_v59  ;;  %v606_v24 = vadd.f32 %v605_v51, %v598_v63  ;;  %v441_v25 = vmul.f32 %v992_v58, %v440_v20  ;;  %v433_v42 = vmul.f32 %v432_v17, %v924_v26 }
  0xc3   :  { %719 = vlog2.f32 %v942_v60  ;;  %v351_v1 = vadd.f32 %v333_v45, %v315_v44  ;;  %v1043_v32 = vadd.f32 %v942_v60, %v940_v59  ;;  %v599_v41 = vand.u32 2147483647, %v590_v39 }
  0xc4   :  { %v196_v49 = vpop.f32.mrf.mxu0  ;;  %v267_v54 = vpop.f32.mrf.mxu1  ;;  %721 = vlog2.f32 %v967_v48  ;;  %v537_v43 = vadd.f32 %v536_v19, %v942_v60  ;;  %v423_v47 = vsel %vm422_vm5, %v911_v14, %v421_v52  ;;  %v442_v55 = vmul.f32 0.5, %v441_v25 }
  0xc5   :  { %v307_v57 = vmul.f32 %v196_v49, %v196_v49  ;;  %v325_v8 = vmul.f32 %v267_v54, %v267_v54  ;;  %v1005_v9 = vmax.f32 %v351_v1, 1e-07  ;;  %723 = vlog2.f32 %v972_v28 }
  0xc6   :  { %v449_v59 = vand.u32 2147483648, %v960_v16  ;;  %v435_v60 = vsel %vm434_vm7, %v924_v26, %v433_v42  ;;  %v426_v1 = vsel %vm424_vm6, %v425_v53, %v423_v47  ;;  %v443_v35 = vsub.f32 1.5, %v442_v55 }
  0xc7   :  { %v1007_v12 = vpop.eup %715  ;;  %v343_v37 = vadd.f32 %v325_v8, %v307_v57  ;;  %v1025_v21 = vmul.f32 %v1005_v9, %v1001_v6  ;;  %v1073_v14 = vmul.f32 2.0, %v426_v1  ;;  %vm446_vm9 = vcmp.eq.f32.partialorder %v960_v16, inf }
  0xc8   :  { %v223_v2 = vpop.f32.mrf.mxu2  ;;  %v294_v3 = vpop.f32.mrf.mxu3  ;;  %v452_v22 = vmul.f32 %v1007_v12, %v984_v38  ;;  %v444_v52 = vmul.f32 %v992_v58, %v443_v35  ;;  %vm448_vm10 = vcmp.eq.f32.partialorder %v960_v16, 0.0  ;;  %vm458_vm11 = vcmp.eq.f32.partialorder %v984_v38, inf }
  0xc9   :  { %v316_v10 = vmul.f32 %v223_v2, %v223_v2  ;;  %v334_v11 = vmul.f32 %v294_v3, %v294_v3  ;;  %v718_v18 = vpop.eup %717  ;;  %725 = vrsqrt.f32 %v1025_v21  ;;  %v1039_v30 = vmax.f32 %v343_v37, 1e-07 }
  0xca   :  { %v720_v13 = vpop.eup %719  ;;  %v578_v31 = vmul.f32 0.6931472, %v718_v18  ;;  %v453_v36 = vmul.f32 %v1007_v12, %v452_v22  ;;  %727 = vlog2.f32 %v1001_v6  ;;  %v438_v3 = vsel %vm436_vm8, %v437_v56, %v435_v60 }
  0xcb   :  { %v352_v27 = vadd.f32 %v334_v11, %v316_v10  ;;  %v560_v33 = vmul.f32 0.6931472, %v720_v13  ;;  %v722_v46 = vpop.eup %721  ;;  %729 = vlog2.f32 %v1005_v9  ;;  %v607_v10 = vadd.f32 %v606_v24, %v599_v41 }
  0xcc   :  { %v199_v40 = vpop.f32.mrf.mxu0  ;;  %v270_v45 = vpop.f32.mrf.mxu1  ;;  %731 = vlog2.f32 %v1039_v30  ;;  %v454_v61 = vmul.f32 0.5, %v453_v36  ;;  %v580_v57 = vmul.f32 0.6931472, %v722_v46  ;;  %v538_v11 = vadd.f32 %v537_v43, %v972_v28 }
  0xcd   :  { %v1048_v44 = vmax.f32 %v352_v27, 1e-07  ;;  %v724_v50 = vpop.eup %723  ;;  %v308_v51 = vmul.f32 %v199_v40, %v199_v40  ;;  %v591_v54 = vsub.f32 %v560_v33, %v578_v31  ;;  %v326_v62 = vmul.f32 %v270_v45, %v270_v45 }
  0xce   :  { %v562_v5 = vmul.f32 0.6931472, %v724_v50  ;;  %v455_v18 = vsub.f32 1.5, %v454_v61  ;;  %v1075_v23 = vmul.f32 2.0, %v438_v3  ;;  %v539_v26 = vadd.f32 %v538_v11, %v1005_v9 }
  0xcf   :  { %v1061_v4 = vmul.f32 %v1048_v44, %v1039_v30  ;;  %733 = vlog2.f32 %v1048_v44  ;;  %v726_v0 = vpop.eup %725  ;;  %v344_v15 = vadd.f32 %v326_v62, %v308_v51  ;;  %v600_v53 = vand.u32 2147483647, %v591_v54 }
  0xd0   :  { %v226_v49 = vpop.f32.mrf.mxu2  ;;  %v297_v63 = vpop.f32.mrf.mxu3  ;;  %v464_v8 = vmul.f32 %v726_v0, %v1025_v21  ;;  %v592_v24 = vsub.f32 %v562_v5, %v580_v57  ;;  %v540_v33 = vadd.f32 %v539_v26, %v1048_v44  ;;  %v456_v40 = vmul.f32 %v1007_v12, %v455_v18 }
  0xd1   :  { %735 = vrsqrt.f32 %v1061_v4  ;;  %v317_v2 = vmul.f32 %v226_v49, %v226_v49  ;;  %v728_v20 = vpop.eup %727  ;;  %v335_v17 = vmul.f32 %v297_v63, %v297_v63  ;;  %v1079_v13 = vmax.f32 %v344_v15, 1e-07 }
  0xd2   :  { %v730_v37 = vpop.eup %729  ;;  %v465_v19 = vmul.f32 %v726_v0, %v464_v8  ;;  %v582_v25 = vmul.f32 0.6931472, %v728_v20  ;;  %v510_v55 = vsub.f32 %v980_v34, %v1073_v14  ;;  %v445_v49 = vmul.f32 %v444_v52, %v960_v16 }
  0xd3   :  { %v732_v22 = vpop.eup %731  ;;  %v353_v56 = vadd.f32 %v335_v17, %v317_v2  ;;  %v564_v31 = vmul.f32 0.6931472, %v730_v37  ;;  %737 = vlog2.f32 %v1079_v13  ;;  %vm460_vm12 = vcmp.eq.f32.partialorder %v984_v38, 0.0 }
  0xd4   :  { %v466_v27 = vmul.f32 0.5, %v465_v19  ;;  %v584_v43 = vmul.f32 0.6931472, %v732_v22  ;;  %v457_v51 = vmul.f32 %v456_v40, %v984_v38  ;;  %v461_v54 = vand.u32 2147483648, %v984_v38 }
  0xd5   :  { %v734_v39 = vpop.eup %733  ;;  %v1084_v36 = vmax.f32 %v353_v56, 1e-07  ;;  %v593_v60 = vsub.f32 %v564_v31, %v582_v25  ;;  %v511_v34 = vsub.f32 %v996_v7, %v1075_v23  ;;  %v608_v1 = vadd.f32 %v607_v10, %v600_v53 }
  0xd6   :  { %v467_v41 = vsub.f32 1.5, %v466_v27  ;;  %v566_v58 = vmul.f32 0.6931472, %v734_v39  ;;  %v447_v2 = vsel %vm446_vm9, %v960_v16, %v445_v49  ;;  %vm470_vm13 = vcmp.eq.f32.partialorder %v1025_v21, inf }
  0xd7   :  { %v736_v42 = vpop.eup %735  ;;  %v1091_v46 = vmul.f32 %v1084_v36, %v1079_v13  ;;  %v541_v47 = vadd.f32 %v540_v33, %v1084_v36  ;;  %739 = vlog2.f32 %v1084_v36  ;;  %vm472_vm14 = vcmp.eq.f32.partialorder %v1025_v21, 0.0 }
  0xd8   :  { %v476_v45 = vmul.f32 %v736_v42, %v1061_v4  ;;  %v468_v50 = vmul.f32 %v726_v0, %v467_v41  ;;  %v601_v0 = vand.u32 2147483647, %v592_v24  ;;  %v594_v57 = vsub.f32 %v566_v58, %v584_v43 }
  0xd9   :  { %741 = vrsqrt.f32 %v1091_v46  ;;  %v542_v62 = vrot.slane %v541_v47, 4  ;;  %v738_v63 = vpop.eup %737  ;;  %v602_v20 = vand.u32 2147483647, %v593_v60  ;;  %v459_v7 = vsel %vm458_vm11, %v984_v38, %v457_v51  ;;  %v533_v38 = vld [vmem:[%s1166_s3] sm:$0x1] }
  0xda   :  { %v477_v12 = vmul.f32 %v736_v42, %v476_v45  ;;  %v469_v3 = vmul.f32 %v468_v50, %v1025_v21  ;;  %v586_v11 = vmul.f32 0.6931472, %v738_v63  ;;  %v450_v14 = vsel %vm448_vm10, %v449_v59, %v447_v2 }
  0xdb   :  { %v543_v5 = vadd.f32 %v542_v62, %v541_v47  ;;  %v609_v53 = vadd.f32 %v608_v1, %v601_v0  ;;  %v473_v18 = vand.u32 2147483648, %v1025_v21  ;;  %v603_v19 = vand.u32 2147483647, %v594_v57 }
  0xdc   :  { %v478_v61 = vmul.f32 0.5, %v477_v12  ;;  %v471_v22 = vsel %vm470_vm13, %v1025_v21, %v469_v3  ;;  %v462_v39 = vsel %vm460_vm12, %v461_v54, %v459_v7  ;;  %vm482_vm15 = vcmp.eq.f32.partialorder %v1061_v4, inf }
  0xdd   :  { %v740_v8 = vpop.eup %739  ;;  %v544_v15 = vrot.slane %v543_v5, 2  ;;  %v610_v52 = vadd.f32 %v609_v53, %v602_v20  ;;  %v503_v16 = vmul.f32 2.0, %v450_v14  ;;  %v485_v31 = vand.u32 2147483648, %v1061_v4  ;;  %v372_v53 = vld [vmem:[%s1165_s2] sm:$0x1] }
  0xde   :  { %v479_v35 = vsub.f32 1.5, %v478_v61  ;;  %v568_v17 = vmul.f32 0.6931472, %v740_v8  ;;  %v504_v41 = vmul.f32 2.0, %v462_v39  ;;  %vm484_vm0 = vcmp.eq.f32.partialorder %v1061_v4, 0.0 }
  0xdf   :  { %v742_v37 = vpop.eup %741  ;;  %v545_v56 = vadd.f32 %v544_v15, %v543_v5  ;;  %v611_v33 = vadd.f32 %v610_v52, %v603_v19  ;;  %v518_v58 = vadd.f32 %v1035_v29, %v510_v55  ;;  %v378_v47 = vadd.f32 %v972_v28, %v967_v48 }
  0xe0   :  { %v480_v10 = vmul.f32 %v736_v42, %v479_v35  ;;  %v488_v26 = vmul.f32 %v742_v37, %v1091_v46  ;;  %v595_v24 = vsub.f32 %v568_v17, %v586_v11  ;;  %v474_v42 = vsel %vm472_vm14, %v473_v18, %v471_v22 }
  0xe1   :  { %v546_v27 = vrot.slane %v545_v56, 1  ;;  %v512_v50 = vsub.f32 %v1043_v32, %v503_v16  ;;  %v505_v12 = vmul.f32 2.0, %v474_v42  ;;  %v519_v54 = vadd.f32 %v518_v58, %v511_v34 }
  0xe2   :  { %v481_v23 = vmul.f32 %v480_v10, %v1061_v4  ;;  %v489_v25 = vmul.f32 %v742_v37, %v488_v26  ;;  %v604_v40 = vand.u32 2147483647, %v595_v24  ;;  %v513_v62 = vsub.f32 %v378_v47, %v504_v41  ;;  %v550_v10 = vld [vmem:[%s1167_s4] sm:$0x1] }
  0xe3   :  { %v547_v45 = vadd.f32 %v546_v27, %v545_v56  ;;  %v520_v28 = vadd.f32 %v519_v54, %v512_v50  ;;  %v380_v32 = vadd.f32 %v1048_v44, %v1039_v30  ;;  %vm494_vm1 = vcmp.eq.f32.partialorder %v1091_v46, inf }
  0xe4   :  { %v483_v59 = vsel %vm482_vm15, %v1061_v4, %v481_v23  ;;  %v490_v43 = vmul.f32 0.5, %v489_v25  ;;  %v612_v49 = vadd.f32 %v611_v33, %v604_v40  ;;  %v379_v4 = vadd.f32 %v1005_v9, %v1001_v6 }
  0xe5   :  { %v486_v21 = vsel %vm484_vm0, %v485_v31, %v483_v59  ;;  %v548_v51 = vadd.f32 %v547_v45, %v533_v38  ;;  %v497_v34 = vand.u32 2147483648, %v1091_v46  ;;  %v521_v6 = vadd.f32 %v520_v28, %v513_v62 }
  0xe6   :  { %v491_v60 = vsub.f32 1.5, %v490_v43  ;;  %v613_v61 = vrot.slane %v612_v49, 4  ;;  %v506_v63 = vmul.f32 2.0, %v486_v21  ;;  %v514_v29 = vsub.f32 %v379_v4, %v505_v12 }
  0xe7   :  { %549 = vst [vmem:[%s1166_s3] sm:$0x1] %v548_v51  ;;  %vm496_vm2 = vcmp.eq.f32.partialorder %v1091_v46, 0.0  ;;  %v381_v5 = vadd.f32 %v1084_v36, %v1079_v13 }
  0xe8   :  { %v492_v1 = vmul.f32 %v742_v37, %v491_v60  ;;  %v614_v48 = vadd.f32 %v613_v61, %v612_v49  ;;  %v515_v9 = vsub.f32 %v380_v32, %v506_v63  ;;  %v522_v35 = vadd.f32 %v521_v6, %v514_v29 }
  0xea   :  { %v493_v55 = vmul.f32 %v492_v1, %v1091_v46  ;;  %v615_v0 = vrot.slane %v614_v48, 2  ;;  %v523_v8 = vadd.f32 %v522_v35, %v515_v9 }
  0xec   :  { %v495_v57 = vsel %vm494_vm1, %v1091_v46, %v493_v55  ;;  %v616_v3 = vadd.f32 %v615_v0, %v614_v48 }
  0xed   :  { %v498_v2 = vsel %vm496_vm2, %v497_v34, %v495_v57 }
  0xee   :  { %v507_v30 = vmul.f32 2.0, %v498_v2  ;;  %v617_v44 = vrot.slane %v616_v3, 1 }
  0xf0   :  { %v516_v20 = vsub.f32 %v381_v5, %v507_v30  ;;  %v618_v11 = vadd.f32 %v617_v44, %v616_v3 }
  0xf2   :  { %v524_v7 = vadd.f32 %v523_v8, %v516_v20  ;;  %v619_v15 = vmul.f32 0.5, %v618_v11 }
  0xf4   :  { %v525_v17 = vrot.slane %v524_v7, 4  ;;  %v620_v37 = vadd.f32 %v619_v15, %v550_v10 }
  0xf6   :  { %v526_v46 = vadd.f32 %v525_v17, %v524_v7  ;;  %621 = vst [vmem:[%s1167_s4] sm:$0x1] %v620_v37 }
  0xf8   :  { %v527_v14 = vrot.slane %v526_v46, 2 }
  0xfa   :  { %v528_v13 = vadd.f32 %v527_v14, %v526_v46 }
  0xfc   :  { %v529_v36 = vrot.slane %v528_v13, 1 }
  0xfe   :  { %v530_v18 = vadd.f32 %v529_v36, %v528_v13 }
 0x100   :  { %v531_v19 = vadd.f32 %v530_v18, %v372_v53 }
 0x102   :  { %532 = vst [vmem:[%s1165_s2] sm:$0x1] %v531_v19 }

</bundles_post_ra>
